<compile_context>
chip_gen: v6e
topology: v6e:2x2x1
jax: 0.10.0
libtpu: 0.0.40
codegen_flags: <defaults>
</compile_context>

<pallas_src>
import functools

import jax
import jax.numpy as jnp
from jax.experimental import pallas as pl
from jax.experimental.pallas import tpu as pltpu


# ----------------------------- Pallas kernel ------------------------------- #

def _gate_math(gates, c, H):
    """PyTorch LSTM cell gate math. Gate order: i, f, g, o."""
    i = jax.nn.sigmoid(gates[:, 0 * H:1 * H])
    f = jax.nn.sigmoid(gates[:, 1 * H:2 * H])
    g = jnp.tanh(gates[:, 2 * H:3 * H])
    o = jax.nn.sigmoid(gates[:, 3 * H:4 * H])
    c_new = f * c + i * g
    h_new = o * jnp.tanh(c_new)
    return h_new, c_new


def fused_autoencoder_kernel(x_ref, enc_wih_ref, enc_whh_ref, enc_b_ref,
                             wlat_ref, blat_ref, wl2h_ref, bl2h_ref,
                             dec_whh_ref, dec_b_ref, dec_wcomb_ref,
                             dec_bcomb_ref, dec_wfc_ref, dec_bfc_ref,
                             out_ref):
    f32 = jnp.float32
    B = out_ref.shape[0]
    TB, D = x_ref.shape
    T = TB // B
    H = enc_whh_ref.shape[0]
    S = out_ref.shape[1] // D

    # ------------------------------ encoder ------------------------------- #
    # Hoisted input projection: one (T*B, D) @ (D, 4H) matmul for all T steps
    # (off the serial recurrence critical path).
    xg = jnp.dot(x_ref[...], enc_wih_ref[...], preferred_element_type=f32)

    enc_whh = enc_whh_ref[...]
    enc_b = enc_b_ref[...]
    h = jnp.zeros((B, H), f32)
    c = jnp.zeros((B, H), f32)
    for t in range(T):  # static trip count, fully unrolled
        gates = (xg[t * B:(t + 1) * B, :]
                 + jnp.dot(h, enc_whh, preferred_element_type=f32)
                 + enc_b)
        h, c = _gate_math(gates, c, H)

    # hidden_to_latent applied to the final hidden state (hidden[-1]).
    latent = (jnp.dot(h, wlat_ref[...], preferred_element_type=f32)
              + blat_ref[...])

    # ------------------------------ decoder ------------------------------- #
    dec_whh = dec_whh_ref[...]
    dec_b = dec_b_ref[...]
    dec_wcomb = dec_wcomb_ref[...]
    dec_bcomb = dec_bcomb_ref[...]
    dec_wfc = dec_wfc_ref[...]
    dec_bfc = dec_bfc_ref[...]

    # hidden = latent_to_hidden(latent); cell = 0; input_seq = 0
    h = (jnp.dot(latent, wl2h_ref[...], preferred_element_type=f32)
         + bl2h_ref[...])
    c = jnp.zeros((B, H), f32)

    for s in range(S):  # static trip count, fully unrolled
        if s == 0:
            # First input is zero: gates = h @ W_hh + b.
            gates = jnp.dot(h, dec_whh, preferred_element_type=f32) + dec_b
        else:
            # Feedback path folded into the recurrent weight: single matmul
            # on the serial chain.
            gates = (jnp.dot(h, dec_wcomb, preferred_element_type=f32)
                     + dec_bcomb)
        h, c = _gate_math(gates, c, H)
        y = jnp.dot(h, dec_wfc, preferred_element_type=f32) + dec_bfc
        # Accumulate into the lane-dense (B, S*D) output block (VMEM);
        # the HBM writeback happens once after the kernel body.
        out_ref[:, s * D:(s + 1) * D] = y


# ------------------------------ JAX wrapper -------------------------------- #

def lstm_autoencoder_forward(x, params, sequence_length):
    """x: (B, T, input_size) float32 -> (B, sequence_length, input_size)."""
    B, T, D = x.shape
    f32 = jnp.float32

    # Time-major flattening so each encoder step's inputs are contiguous rows
    # of the hoisted projection (tiny ~1 KiB transform, done once per call).
    x_tm = jnp.transpose(x, (1, 0, 2)).reshape(T * B, D)

    # Algebraic fold of the decoder feedback path:
    #   x_{s+1} = h_s @ W_fc + b_fc
    #   => gates_{s+1} = h_s @ (W_fc @ W_ih + W_hh) + (b_fc @ W_ih + b)
    dec_w_comb = (jnp.dot(params["dec_w_fc"], params["dec_w_ih"],
                          preferred_element_type=f32) + params["dec_w_hh"])
    dec_b_comb = (jnp.dot(params["dec_b_fc"], params["dec_w_ih"],
                          preferred_element_type=f32) + params["dec_b"])

    inputs = (x_tm,
              params["enc_w_ih"], params["enc_w_hh"], params["enc_b"],
              params["enc_w_lat"], params["enc_b_lat"],
              params["dec_w_l2h"], params["dec_b_l2h"],
              params["dec_w_hh"], params["dec_b"],
              dec_w_comb, dec_b_comb,
              params["dec_w_fc"], params["dec_b_fc"])

    vmem = pltpu.MemorySpace.VMEM
    out2d = pl.pallas_call(
        fused_autoencoder_kernel,
        out_shape=jax.ShapeDtypeStruct((B, sequence_length * D), f32),
        in_specs=[pl.BlockSpec(memory_space=vmem) for _ in inputs],
        out_specs=pl.BlockSpec(memory_space=vmem),
    )(*inputs)

    # (B, S*D) -> (B, S, D): contiguous reshape, no data movement.
    return out2d.reshape(B, sequence_length, D)


# --------------------------- pure-JAX reference ------------------------------ #

def _ref_forward(x, params, sequence_length):
    B, T, D = x.shape
    H = params["enc_w_hh"].shape[0]

    def step(x_t, h, c, w_ih, w_hh, b):
        gates = x_t @ w_ih + h @ w_hh + b
        i, f, g, o = jnp.split(gates, 4, axis=-1)
        c_new = jax.nn.sigmoid(f) * c + jax.nn.sigmoid(i) * jnp.tanh(g)
        h_new = jax.nn.sigmoid(o) * jnp.tanh(c_new)
        return h_new, c_new

    h = jnp.zeros((B, H), jnp.float32)
    c = jnp.zeros((B, H), jnp.float32)
    for t in range(T):
        h, c = step(x[:, t], h, c,
                    params["enc_w_ih"], params["enc_w_hh"], params["enc_b"])
    latent = h @ params["enc_w_lat"] + params["enc_b_lat"]

    h = latent @ params["dec_w_l2h"] + params["dec_b_l2h"]
    c = jnp.zeros_like(h)
    x_in = jnp.zeros((B, D), jnp.float32)
    outs = []
    for _ in range(sequence_length):
        h, c = step(x_in, h, c,
                    params["dec_w_ih"], params["dec_w_hh"], params["dec_b"])
        x_in = h @ params["dec_w_fc"] + params["dec_b_fc"]
        outs.append(x_in)
    return jnp.stack(outs, axis=1)


# ---------------------------------- main ------------------------------------ #

if __name__ == "__main__":
    B, T = 2, 8
    INPUT_SIZE, HIDDEN, LATENT, SEQ_LEN = 16, 32, 8, 8

    key = jax.random.PRNGKey(0)
    keys = jax.random.split(key, 16)
    nrm = lambda k, shape: (0.1 * jax.random.normal(k, shape)).astype(jnp.float32)

    params = {
        # encoder LSTM (input_size -> hidden), gate order [i,f,g,o]
        "enc_w_ih": nrm(keys[0], (INPUT_SIZE, 4 * HIDDEN)),
        "enc_w_hh": nrm(keys[1], (HIDDEN, 4 * HIDDEN)),
        "enc_b":    nrm(keys[2], (1, 4 * HIDDEN)),        # b_ih + b_hh combined
        # encoder hidden_to_latent
        "enc_w_lat": nrm(keys[3], (HIDDEN, LATENT)),
        "enc_b_lat": nrm(keys[4], (1, LATENT)),
        # decoder latent_to_hidden
        "dec_w_l2h": nrm(keys[5], (LATENT, HIDDEN)),
        "dec_b_l2h": nrm(keys[6], (1, HIDDEN)),
        # decoder LSTM (output_size -> hidden)
        "dec_w_ih": nrm(keys[7], (INPUT_SIZE, 4 * HIDDEN)),
        "dec_w_hh": nrm(keys[8], (HIDDEN, 4 * HIDDEN)),
        "dec_b":    nrm(keys[9], (1, 4 * HIDDEN)),
        # decoder fc (hidden -> output_size)
        "dec_w_fc": nrm(keys[10], (HIDDEN, INPUT_SIZE)),
        "dec_b_fc": nrm(keys[11], (1, INPUT_SIZE)),
    }

    x = jax.random.normal(keys[12], (B, T, INPUT_SIZE), dtype=jnp.float32)

    fwd = jax.jit(functools.partial(lstm_autoencoder_forward,
                                    sequence_length=SEQ_LEN))
    out = fwd(x, params)
    out = jax.block_until_ready(out)

    assert out.shape == (B, SEQ_LEN, INPUT_SIZE), out.shape

    ref = _ref_forward(x, params, SEQ_LEN)
    assert jnp.allclose(out, ref, atol=1e-4, rtol=1e-4), \
        float(jnp.max(jnp.abs(out - ref)))

    print("KERNEL_OK")
</pallas_src>

<mosaic_0001>
module attributes {stable_mosaic.version = 11 : i64} {
  func.func @fused_autoencoder_kernel(%arg0: memref<16x16xf32, #tpu.memory_space<vmem>>, %arg1: memref<16x128xf32, #tpu.memory_space<vmem>>, %arg2: memref<32x128xf32, #tpu.memory_space<vmem>>, %arg3: memref<1x128xf32, #tpu.memory_space<vmem>>, %arg4: memref<32x8xf32, #tpu.memory_space<vmem>>, %arg5: memref<1x8xf32, #tpu.memory_space<vmem>>, %arg6: memref<8x32xf32, #tpu.memory_space<vmem>>, %arg7: memref<1x32xf32, #tpu.memory_space<vmem>>, %arg8: memref<32x128xf32, #tpu.memory_space<vmem>>, %arg9: memref<1x128xf32, #tpu.memory_space<vmem>>, %arg10: memref<32x128xf32, #tpu.memory_space<vmem>>, %arg11: memref<1x128xf32, #tpu.memory_space<vmem>>, %arg12: memref<32x16xf32, #tpu.memory_space<vmem>>, %arg13: memref<1x16xf32, #tpu.memory_space<vmem>>, %arg14: memref<2x128xf32, #tpu.memory_space<vmem>>) attributes {dimension_semantics = [], scalar_prefetch = 0 : i64, scratch_operands = 0 : i64, tpu.core_type = #tpu.core_type<tc>} {
    %c0 = arith.constant 0 : index
    %c0_0 = arith.constant 0 : index
    %0 = vector.load %arg0[%c0, %c0_0] : memref<16x16xf32, #tpu.memory_space<vmem>>, vector<16x16xf32>
    %c0_1 = arith.constant 0 : index
    %c0_2 = arith.constant 0 : index
    %1 = vector.load %arg1[%c0_1, %c0_2] : memref<16x128xf32, #tpu.memory_space<vmem>>, vector<16x128xf32>
    %cst = arith.constant dense<0.000000e+00> : vector<16x128xf32>
    %2 = tpu.matmul %0, %1, %cst {dimension_numbers = #tpu.dot_dimension_numbers<[1], [0], [0], [1], [0, 0, 1, 1], [], []>} : vector<16x16xf32>, vector<16x128xf32>, vector<16x128xf32> -> vector<16x128xf32>
    %c0_3 = arith.constant 0 : index
    %c0_4 = arith.constant 0 : index
    %3 = vector.load %arg2[%c0_3, %c0_4] : memref<32x128xf32, #tpu.memory_space<vmem>>, vector<32x128xf32>
    %c0_5 = arith.constant 0 : index
    %c0_6 = arith.constant 0 : index
    %4 = vector.load %arg3[%c0_5, %c0_6] : memref<1x128xf32, #tpu.memory_space<vmem>>, vector<1x128xf32>
    %cst_7 = arith.constant 0.000000e+00 : f32
    %5 = vector.broadcast %cst_7 : f32 to vector<2x32xf32>
    %cst_8 = arith.constant 0.000000e+00 : f32
    %6 = vector.broadcast %cst_8 : f32 to vector<2x32xf32>
    %7 = vector.extract_strided_slice %2 {offsets = [0, 0], sizes = [2, 128], strides = [1, 1]} : vector<16x128xf32> to vector<2x128xf32>
    %cst_9 = arith.constant dense<0.000000e+00> : vector<2x128xf32>
    %8 = tpu.matmul %5, %3, %cst_9 {dimension_numbers = #tpu.dot_dimension_numbers<[1], [0], [0], [1], [0, 0, 1, 1], [], []>} : vector<2x32xf32>, vector<32x128xf32>, vector<2x128xf32> -> vector<2x128xf32>
    %9 = arith.addf %7, %8 : vector<2x128xf32>
    %10 = vector.broadcast %4 : vector<1x128xf32> to vector<2x128xf32>
    %11 = arith.addf %9, %10 : vector<2x128xf32>
    %12 = vector.extract_strided_slice %11 {offsets = [0, 0], sizes = [2, 32], strides = [1, 1]} : vector<2x128xf32> to vector<2x32xf32>
    %13 = arith.negf %12 : vector<2x32xf32>
    %14 = math.exp %13 : vector<2x32xf32>
    %cst_10 = arith.constant 1.000000e+00 : f32
    %15 = vector.broadcast %cst_10 : f32 to vector<2x32xf32>
    %16 = arith.addf %15, %14 : vector<2x32xf32>
    %17 = arith.divf %15, %16 : vector<2x32xf32>
    %18 = vector.extract_strided_slice %11 {offsets = [0, 32], sizes = [2, 32], strides = [1, 1]} : vector<2x128xf32> to vector<2x32xf32>
    %19 = arith.negf %18 : vector<2x32xf32>
    %20 = math.exp %19 : vector<2x32xf32>
    %cst_11 = arith.constant 1.000000e+00 : f32
    %21 = vector.broadcast %cst_11 : f32 to vector<2x32xf32>
    %22 = arith.addf %21, %20 : vector<2x32xf32>
    %23 = arith.divf %21, %22 : vector<2x32xf32>
    %24 = vector.extract_strided_slice %11 {offsets = [0, 64], sizes = [2, 32], strides = [1, 1]} : vector<2x128xf32> to vector<2x32xf32>
    %25 = math.tanh %24 : vector<2x32xf32>
    %26 = vector.extract_strided_slice %11 {offsets = [0, 96], sizes = [2, 32], strides = [1, 1]} : vector<2x128xf32> to vector<2x32xf32>
    %27 = arith.negf %26 : vector<2x32xf32>
    %28 = math.exp %27 : vector<2x32xf32>
    %cst_12 = arith.constant 1.000000e+00 : f32
    %29 = vector.broadcast %cst_12 : f32 to vector<2x32xf32>
    %30 = arith.addf %29, %28 : vector<2x32xf32>
    %31 = arith.divf %29, %30 : vector<2x32xf32>
    %32 = arith.mulf %23, %6 : vector<2x32xf32>
    %33 = arith.mulf %17, %25 : vector<2x32xf32>
    %34 = arith.addf %32, %33 : vector<2x32xf32>
    %35 = math.tanh %34 : vector<2x32xf32>
    %36 = arith.mulf %31, %35 : vector<2x32xf32>
    %37 = vector.extract_strided_slice %2 {offsets = [2, 0], sizes = [2, 128], strides = [1, 1]} : vector<16x128xf32> to vector<2x128xf32>
    %cst_13 = arith.constant dense<0.000000e+00> : vector<2x128xf32>
    %38 = tpu.matmul %36, %3, %cst_13 {dimension_numbers = #tpu.dot_dimension_numbers<[1], [0], [0], [1], [0, 0, 1, 1], [], []>} : vector<2x32xf32>, vector<32x128xf32>, vector<2x128xf32> -> vector<2x128xf32>
    %39 = arith.addf %37, %38 : vector<2x128xf32>
    %40 = vector.broadcast %4 : vector<1x128xf32> to vector<2x128xf32>
    %41 = arith.addf %39, %40 : vector<2x128xf32>
    %42 = vector.extract_strided_slice %41 {offsets = [0, 0], sizes = [2, 32], strides = [1, 1]} : vector<2x128xf32> to vector<2x32xf32>
    %43 = arith.negf %42 : vector<2x32xf32>
    %44 = math.exp %43 : vector<2x32xf32>
    %cst_14 = arith.constant 1.000000e+00 : f32
    %45 = vector.broadcast %cst_14 : f32 to vector<2x32xf32>
    %46 = arith.addf %45, %44 : vector<2x32xf32>
    %47 = arith.divf %45, %46 : vector<2x32xf32>
    %48 = vector.extract_strided_slice %41 {offsets = [0, 32], sizes = [2, 32], strides = [1, 1]} : vector<2x128xf32> to vector<2x32xf32>
    %49 = arith.negf %48 : vector<2x32xf32>
    %50 = math.exp %49 : vector<2x32xf32>
    %cst_15 = arith.constant 1.000000e+00 : f32
    %51 = vector.broadcast %cst_15 : f32 to vector<2x32xf32>
    %52 = arith.addf %51, %50 : vector<2x32xf32>
    %53 = arith.divf %51, %52 : vector<2x32xf32>
    %54 = vector.extract_strided_slice %41 {offsets = [0, 64], sizes = [2, 32], strides = [1, 1]} : vector<2x128xf32> to vector<2x32xf32>
    %55 = math.tanh %54 : vector<2x32xf32>
    %56 = vector.extract_strided_slice %41 {offsets = [0, 96], sizes = [2, 32], strides = [1, 1]} : vector<2x128xf32> to vector<2x32xf32>
    %57 = arith.negf %56 : vector<2x32xf32>
    %58 = math.exp %57 : vector<2x32xf32>
    %cst_16 = arith.constant 1.000000e+00 : f32
    %59 = vector.broadcast %cst_16 : f32 to vector<2x32xf32>
    %60 = arith.addf %59, %58 : vector<2x32xf32>
    %61 = arith.divf %59, %60 : vector<2x32xf32>
    %62 = arith.mulf %53, %34 : vector<2x32xf32>
    %63 = arith.mulf %47, %55 : vector<2x32xf32>
    %64 = arith.addf %62, %63 : vector<2x32xf32>
    %65 = math.tanh %64 : vector<2x32xf32>
    %66 = arith.mulf %61, %65 : vector<2x32xf32>
    %67 = vector.extract_strided_slice %2 {offsets = [4, 0], sizes = [2, 128], strides = [1, 1]} : vector<16x128xf32> to vector<2x128xf32>
    %cst_17 = arith.constant dense<0.000000e+00> : vector<2x128xf32>
    %68 = tpu.matmul %66, %3, %cst_17 {dimension_numbers = #tpu.dot_dimension_numbers<[1], [0], [0], [1], [0, 0, 1, 1], [], []>} : vector<2x32xf32>, vector<32x128xf32>, vector<2x128xf32> -> vector<2x128xf32>
    %69 = arith.addf %67, %68 : vector<2x128xf32>
    %70 = vector.broadcast %4 : vector<1x128xf32> to vector<2x128xf32>
    %71 = arith.addf %69, %70 : vector<2x128xf32>
    %72 = vector.extract_strided_slice %71 {offsets = [0, 0], sizes = [2, 32], strides = [1, 1]} : vector<2x128xf32> to vector<2x32xf32>
    %73 = arith.negf %72 : vector<2x32xf32>
    %74 = math.exp %73 : vector<2x32xf32>
    %cst_18 = arith.constant 1.000000e+00 : f32
    %75 = vector.broadcast %cst_18 : f32 to vector<2x32xf32>
    %76 = arith.addf %75, %74 : vector<2x32xf32>
    %77 = arith.divf %75, %76 : vector<2x32xf32>
    %78 = vector.extract_strided_slice %71 {offsets = [0, 32], sizes = [2, 32], strides = [1, 1]} : vector<2x128xf32> to vector<2x32xf32>
    %79 = arith.negf %78 : vector<2x32xf32>
    %80 = math.exp %79 : vector<2x32xf32>
    %cst_19 = arith.constant 1.000000e+00 : f32
    %81 = vector.broadcast %cst_19 : f32 to vector<2x32xf32>
    %82 = arith.addf %81, %80 : vector<2x32xf32>
    %83 = arith.divf %81, %82 : vector<2x32xf32>
    %84 = vector.extract_strided_slice %71 {offsets = [0, 64], sizes = [2, 32], strides = [1, 1]} : vector<2x128xf32> to vector<2x32xf32>
    %85 = math.tanh %84 : vector<2x32xf32>
    %86 = vector.extract_strided_slice %71 {offsets = [0, 96], sizes = [2, 32], strides = [1, 1]} : vector<2x128xf32> to vector<2x32xf32>
    %87 = arith.negf %86 : vector<2x32xf32>
    %88 = math.exp %87 : vector<2x32xf32>
    %cst_20 = arith.constant 1.000000e+00 : f32
    %89 = vector.broadcast %cst_20 : f32 to vector<2x32xf32>
    %90 = arith.addf %89, %88 : vector<2x32xf32>
    %91 = arith.divf %89, %90 : vector<2x32xf32>
    %92 = arith.mulf %83, %64 : vector<2x32xf32>
    %93 = arith.mulf %77, %85 : vector<2x32xf32>
    %94 = arith.addf %92, %93 : vector<2x32xf32>
    %95 = math.tanh %94 : vector<2x32xf32>
    %96 = arith.mulf %91, %95 : vector<2x32xf32>
    %97 = vector.extract_strided_slice %2 {offsets = [6, 0], sizes = [2, 128], strides = [1, 1]} : vector<16x128xf32> to vector<2x128xf32>
    %cst_21 = arith.constant dense<0.000000e+00> : vector<2x128xf32>
    %98 = tpu.matmul %96, %3, %cst_21 {dimension_numbers = #tpu.dot_dimension_numbers<[1], [0], [0], [1], [0, 0, 1, 1], [], []>} : vector<2x32xf32>, vector<32x128xf32>, vector<2x128xf32> -> vector<2x128xf32>
    %99 = arith.addf %97, %98 : vector<2x128xf32>
    %100 = vector.broadcast %4 : vector<1x128xf32> to vector<2x128xf32>
    %101 = arith.addf %99, %100 : vector<2x128xf32>
    %102 = vector.extract_strided_slice %101 {offsets = [0, 0], sizes = [2, 32], strides = [1, 1]} : vector<2x128xf32> to vector<2x32xf32>
    %103 = arith.negf %102 : vector<2x32xf32>
    %104 = math.exp %103 : vector<2x32xf32>
    %cst_22 = arith.constant 1.000000e+00 : f32
    %105 = vector.broadcast %cst_22 : f32 to vector<2x32xf32>
    %106 = arith.addf %105, %104 : vector<2x32xf32>
    %107 = arith.divf %105, %106 : vector<2x32xf32>
    %108 = vector.extract_strided_slice %101 {offsets = [0, 32], sizes = [2, 32], strides = [1, 1]} : vector<2x128xf32> to vector<2x32xf32>
    %109 = arith.negf %108 : vector<2x32xf32>
    %110 = math.exp %109 : vector<2x32xf32>
    %cst_23 = arith.constant 1.000000e+00 : f32
    %111 = vector.broadcast %cst_23 : f32 to vector<2x32xf32>
    %112 = arith.addf %111, %110 : vector<2x32xf32>
    %113 = arith.divf %111, %112 : vector<2x32xf32>
    %114 = vector.extract_strided_slice %101 {offsets = [0, 64], sizes = [2, 32], strides = [1, 1]} : vector<2x128xf32> to vector<2x32xf32>
    %115 = math.tanh %114 : vector<2x32xf32>
    %116 = vector.extract_strided_slice %101 {offsets = [0, 96], sizes = [2, 32], strides = [1, 1]} : vector<2x128xf32> to vector<2x32xf32>
    %117 = arith.negf %116 : vector<2x32xf32>
    %118 = math.exp %117 : vector<2x32xf32>
    %cst_24 = arith.constant 1.000000e+00 : f32
    %119 = vector.broadcast %cst_24 : f32 to vector<2x32xf32>
    %120 = arith.addf %119, %118 : vector<2x32xf32>
    %121 = arith.divf %119, %120 : vector<2x32xf32>
    %122 = arith.mulf %113, %94 : vector<2x32xf32>
    %123 = arith.mulf %107, %115 : vector<2x32xf32>
    %124 = arith.addf %122, %123 : vector<2x32xf32>
    %125 = math.tanh %124 : vector<2x32xf32>
    %126 = arith.mulf %121, %125 : vector<2x32xf32>
    %127 = vector.extract_strided_slice %2 {offsets = [8, 0], sizes = [2, 128], strides = [1, 1]} : vector<16x128xf32> to vector<2x128xf32>
    %cst_25 = arith.constant dense<0.000000e+00> : vector<2x128xf32>
    %128 = tpu.matmul %126, %3, %cst_25 {dimension_numbers = #tpu.dot_dimension_numbers<[1], [0], [0], [1], [0, 0, 1, 1], [], []>} : vector<2x32xf32>, vector<32x128xf32>, vector<2x128xf32> -> vector<2x128xf32>
    %129 = arith.addf %127, %128 : vector<2x128xf32>
    %130 = vector.broadcast %4 : vector<1x128xf32> to vector<2x128xf32>
    %131 = arith.addf %129, %130 : vector<2x128xf32>
    %132 = vector.extract_strided_slice %131 {offsets = [0, 0], sizes = [2, 32], strides = [1, 1]} : vector<2x128xf32> to vector<2x32xf32>
    %133 = arith.negf %132 : vector<2x32xf32>
    %134 = math.exp %133 : vector<2x32xf32>
    %cst_26 = arith.constant 1.000000e+00 : f32
    %135 = vector.broadcast %cst_26 : f32 to vector<2x32xf32>
    %136 = arith.addf %135, %134 : vector<2x32xf32>
    %137 = arith.divf %135, %136 : vector<2x32xf32>
    %138 = vector.extract_strided_slice %131 {offsets = [0, 32], sizes = [2, 32], strides = [1, 1]} : vector<2x128xf32> to vector<2x32xf32>
    %139 = arith.negf %138 : vector<2x32xf32>
    %140 = math.exp %139 : vector<2x32xf32>
    %cst_27 = arith.constant 1.000000e+00 : f32
    %141 = vector.broadcast %cst_27 : f32 to vector<2x32xf32>
    %142 = arith.addf %141, %140 : vector<2x32xf32>
    %143 = arith.divf %141, %142 : vector<2x32xf32>
    %144 = vector.extract_strided_slice %131 {offsets = [0, 64], sizes = [2, 32], strides = [1, 1]} : vector<2x128xf32> to vector<2x32xf32>
    %145 = math.tanh %144 : vector<2x32xf32>
    %146 = vector.extract_strided_slice %131 {offsets = [0, 96], sizes = [2, 32], strides = [1, 1]} : vector<2x128xf32> to vector<2x32xf32>
    %147 = arith.negf %146 : vector<2x32xf32>
    %148 = math.exp %147 : vector<2x32xf32>
    %cst_28 = arith.constant 1.000000e+00 : f32
    %149 = vector.broadcast %cst_28 : f32 to vector<2x32xf32>
    %150 = arith.addf %149, %148 : vector<2x32xf32>
    %151 = arith.divf %149, %150 : vector<2x32xf32>
    %152 = arith.mulf %143, %124 : vector<2x32xf32>
    %153 = arith.mulf %137, %145 : vector<2x32xf32>
    %154 = arith.addf %152, %153 : vector<2x32xf32>
    %155 = math.tanh %154 : vector<2x32xf32>
    %156 = arith.mulf %151, %155 : vector<2x32xf32>
    %157 = vector.extract_strided_slice %2 {offsets = [10, 0], sizes = [2, 128], strides = [1, 1]} : vector<16x128xf32> to vector<2x128xf32>
    %cst_29 = arith.constant dense<0.000000e+00> : vector<2x128xf32>
    %158 = tpu.matmul %156, %3, %cst_29 {dimension_numbers = #tpu.dot_dimension_numbers<[1], [0], [0], [1], [0, 0, 1, 1], [], []>} : vector<2x32xf32>, vector<32x128xf32>, vector<2x128xf32> -> vector<2x128xf32>
    %159 = arith.addf %157, %158 : vector<2x128xf32>
    %160 = vector.broadcast %4 : vector<1x128xf32> to vector<2x128xf32>
    %161 = arith.addf %159, %160 : vector<2x128xf32>
    %162 = vector.extract_strided_slice %161 {offsets = [0, 0], sizes = [2, 32], strides = [1, 1]} : vector<2x128xf32> to vector<2x32xf32>
    %163 = arith.negf %162 : vector<2x32xf32>
    %164 = math.exp %163 : vector<2x32xf32>
    %cst_30 = arith.constant 1.000000e+00 : f32
    %165 = vector.broadcast %cst_30 : f32 to vector<2x32xf32>
    %166 = arith.addf %165, %164 : vector<2x32xf32>
    %167 = arith.divf %165, %166 : vector<2x32xf32>
    %168 = vector.extract_strided_slice %161 {offsets = [0, 32], sizes = [2, 32], strides = [1, 1]} : vector<2x128xf32> to vector<2x32xf32>
    %169 = arith.negf %168 : vector<2x32xf32>
    %170 = math.exp %169 : vector<2x32xf32>
    %cst_31 = arith.constant 1.000000e+00 : f32
    %171 = vector.broadcast %cst_31 : f32 to vector<2x32xf32>
    %172 = arith.addf %171, %170 : vector<2x32xf32>
    %173 = arith.divf %171, %172 : vector<2x32xf32>
    %174 = vector.extract_strided_slice %161 {offsets = [0, 64], sizes = [2, 32], strides = [1, 1]} : vector<2x128xf32> to vector<2x32xf32>
    %175 = math.tanh %174 : vector<2x32xf32>
    %176 = vector.extract_strided_slice %161 {offsets = [0, 96], sizes = [2, 32], strides = [1, 1]} : vector<2x128xf32> to vector<2x32xf32>
    %177 = arith.negf %176 : vector<2x32xf32>
    %178 = math.exp %177 : vector<2x32xf32>
    %cst_32 = arith.constant 1.000000e+00 : f32
    %179 = vector.broadcast %cst_32 : f32 to vector<2x32xf32>
    %180 = arith.addf %179, %178 : vector<2x32xf32>
    %181 = arith.divf %179, %180 : vector<2x32xf32>
    %182 = arith.mulf %173, %154 : vector<2x32xf32>
    %183 = arith.mulf %167, %175 : vector<2x32xf32>
    %184 = arith.addf %182, %183 : vector<2x32xf32>
    %185 = math.tanh %184 : vector<2x32xf32>
    %186 = arith.mulf %181, %185 : vector<2x32xf32>
    %187 = vector.extract_strided_slice %2 {offsets = [12, 0], sizes = [2, 128], strides = [1, 1]} : vector<16x128xf32> to vector<2x128xf32>
    %cst_33 = arith.constant dense<0.000000e+00> : vector<2x128xf32>
    %188 = tpu.matmul %186, %3, %cst_33 {dimension_numbers = #tpu.dot_dimension_numbers<[1], [0], [0], [1], [0, 0, 1, 1], [], []>} : vector<2x32xf32>, vector<32x128xf32>, vector<2x128xf32> -> vector<2x128xf32>
    %189 = arith.addf %187, %188 : vector<2x128xf32>
    %190 = vector.broadcast %4 : vector<1x128xf32> to vector<2x128xf32>
    %191 = arith.addf %189, %190 : vector<2x128xf32>
    %192 = vector.extract_strided_slice %191 {offsets = [0, 0], sizes = [2, 32], strides = [1, 1]} : vector<2x128xf32> to vector<2x32xf32>
    %193 = arith.negf %192 : vector<2x32xf32>
    %194 = math.exp %193 : vector<2x32xf32>
    %cst_34 = arith.constant 1.000000e+00 : f32
    %195 = vector.broadcast %cst_34 : f32 to vector<2x32xf32>
    %196 = arith.addf %195, %194 : vector<2x32xf32>
    %197 = arith.divf %195, %196 : vector<2x32xf32>
    %198 = vector.extract_strided_slice %191 {offsets = [0, 32], sizes = [2, 32], strides = [1, 1]} : vector<2x128xf32> to vector<2x32xf32>
    %199 = arith.negf %198 : vector<2x32xf32>
    %200 = math.exp %199 : vector<2x32xf32>
    %cst_35 = arith.constant 1.000000e+00 : f32
    %201 = vector.broadcast %cst_35 : f32 to vector<2x32xf32>
    %202 = arith.addf %201, %200 : vector<2x32xf32>
    %203 = arith.divf %201, %202 : vector<2x32xf32>
    %204 = vector.extract_strided_slice %191 {offsets = [0, 64], sizes = [2, 32], strides = [1, 1]} : vector<2x128xf32> to vector<2x32xf32>
    %205 = math.tanh %204 : vector<2x32xf32>
    %206 = vector.extract_strided_slice %191 {offsets = [0, 96], sizes = [2, 32], strides = [1, 1]} : vector<2x128xf32> to vector<2x32xf32>
    %207 = arith.negf %206 : vector<2x32xf32>
    %208 = math.exp %207 : vector<2x32xf32>
    %cst_36 = arith.constant 1.000000e+00 : f32
    %209 = vector.broadcast %cst_36 : f32 to vector<2x32xf32>
    %210 = arith.addf %209, %208 : vector<2x32xf32>
    %211 = arith.divf %209, %210 : vector<2x32xf32>
    %212 = arith.mulf %203, %184 : vector<2x32xf32>
    %213 = arith.mulf %197, %205 : vector<2x32xf32>
    %214 = arith.addf %212, %213 : vector<2x32xf32>
    %215 = math.tanh %214 : vector<2x32xf32>
    %216 = arith.mulf %211, %215 : vector<2x32xf32>
    %217 = vector.extract_strided_slice %2 {offsets = [14, 0], sizes = [2, 128], strides = [1, 1]} : vector<16x128xf32> to vector<2x128xf32>
    %cst_37 = arith.constant dense<0.000000e+00> : vector<2x128xf32>
    %218 = tpu.matmul %216, %3, %cst_37 {dimension_numbers = #tpu.dot_dimension_numbers<[1], [0], [0], [1], [0, 0, 1, 1], [], []>} : vector<2x32xf32>, vector<32x128xf32>, vector<2x128xf32> -> vector<2x128xf32>
    %219 = arith.addf %217, %218 : vector<2x128xf32>
    %220 = vector.broadcast %4 : vector<1x128xf32> to vector<2x128xf32>
    %221 = arith.addf %219, %220 : vector<2x128xf32>
    %222 = vector.extract_strided_slice %221 {offsets = [0, 0], sizes = [2, 32], strides = [1, 1]} : vector<2x128xf32> to vector<2x32xf32>
    %223 = arith.negf %222 : vector<2x32xf32>
    %224 = math.exp %223 : vector<2x32xf32>
    %cst_38 = arith.constant 1.000000e+00 : f32
    %225 = vector.broadcast %cst_38 : f32 to vector<2x32xf32>
    %226 = arith.addf %225, %224 : vector<2x32xf32>
    %227 = arith.divf %225, %226 : vector<2x32xf32>
    %228 = vector.extract_strided_slice %221 {offsets = [0, 32], sizes = [2, 32], strides = [1, 1]} : vector<2x128xf32> to vector<2x32xf32>
    %229 = arith.negf %228 : vector<2x32xf32>
    %230 = math.exp %229 : vector<2x32xf32>
    %cst_39 = arith.constant 1.000000e+00 : f32
    %231 = vector.broadcast %cst_39 : f32 to vector<2x32xf32>
    %232 = arith.addf %231, %230 : vector<2x32xf32>
    %233 = arith.divf %231, %232 : vector<2x32xf32>
    %234 = vector.extract_strided_slice %221 {offsets = [0, 64], sizes = [2, 32], strides = [1, 1]} : vector<2x128xf32> to vector<2x32xf32>
    %235 = math.tanh %234 : vector<2x32xf32>
    %236 = vector.extract_strided_slice %221 {offsets = [0, 96], sizes = [2, 32], strides = [1, 1]} : vector<2x128xf32> to vector<2x32xf32>
    %237 = arith.negf %236 : vector<2x32xf32>
    %238 = math.exp %237 : vector<2x32xf32>
    %cst_40 = arith.constant 1.000000e+00 : f32
    %239 = vector.broadcast %cst_40 : f32 to vector<2x32xf32>
    %240 = arith.addf %239, %238 : vector<2x32xf32>
    %241 = arith.divf %239, %240 : vector<2x32xf32>
    %242 = arith.mulf %233, %214 : vector<2x32xf32>
    %243 = arith.mulf %227, %235 : vector<2x32xf32>
    %244 = arith.addf %242, %243 : vector<2x32xf32>
    %245 = math.tanh %244 : vector<2x32xf32>
    %246 = arith.mulf %241, %245 : vector<2x32xf32>
    %c0_41 = arith.constant 0 : index
    %c0_42 = arith.constant 0 : index
    %247 = vector.load %arg4[%c0_41, %c0_42] : memref<32x8xf32, #tpu.memory_space<vmem>>, vector<32x8xf32>
    %cst_43 = arith.constant dense<0.000000e+00> : vector<2x8xf32>
    %248 = tpu.matmul %246, %247, %cst_43 {dimension_numbers = #tpu.dot_dimension_numbers<[1], [0], [0], [1], [0, 0, 1, 1], [], []>} : vector<2x32xf32>, vector<32x8xf32>, vector<2x8xf32> -> vector<2x8xf32>
    %c0_44 = arith.constant 0 : index
    %c0_45 = arith.constant 0 : index
    %249 = vector.load %arg5[%c0_44, %c0_45] : memref<1x8xf32, #tpu.memory_space<vmem>>, vector<1x8xf32>
    %250 = vector.broadcast %249 : vector<1x8xf32> to vector<2x8xf32>
    %251 = arith.addf %248, %250 : vector<2x8xf32>
    %c0_46 = arith.constant 0 : index
    %c0_47 = arith.constant 0 : index
    %252 = vector.load %arg8[%c0_46, %c0_47] : memref<32x128xf32, #tpu.memory_space<vmem>>, vector<32x128xf32>
    %c0_48 = arith.constant 0 : index
    %c0_49 = arith.constant 0 : index
    %253 = vector.load %arg9[%c0_48, %c0_49] : memref<1x128xf32, #tpu.memory_space<vmem>>, vector<1x128xf32>
    %c0_50 = arith.constant 0 : index
    %c0_51 = arith.constant 0 : index
    %254 = vector.load %arg10[%c0_50, %c0_51] : memref<32x128xf32, #tpu.memory_space<vmem>>, vector<32x128xf32>
    %c0_52 = arith.constant 0 : index
    %c0_53 = arith.constant 0 : index
    %255 = vector.load %arg11[%c0_52, %c0_53] : memref<1x128xf32, #tpu.memory_space<vmem>>, vector<1x128xf32>
    %c0_54 = arith.constant 0 : index
    %c0_55 = arith.constant 0 : index
    %256 = vector.load %arg12[%c0_54, %c0_55] : memref<32x16xf32, #tpu.memory_space<vmem>>, vector<32x16xf32>
    %c0_56 = arith.constant 0 : index
    %c0_57 = arith.constant 0 : index
    %257 = vector.load %arg13[%c0_56, %c0_57] : memref<1x16xf32, #tpu.memory_space<vmem>>, vector<1x16xf32>
    %c0_58 = arith.constant 0 : index
    %c0_59 = arith.constant 0 : index
    %258 = vector.load %arg6[%c0_58, %c0_59] : memref<8x32xf32, #tpu.memory_space<vmem>>, vector<8x32xf32>
    %cst_60 = arith.constant dense<0.000000e+00> : vector<2x32xf32>
    %259 = tpu.matmul %251, %258, %cst_60 {dimension_numbers = #tpu.dot_dimension_numbers<[1], [0], [0], [1], [0, 0, 1, 1], [], []>} : vector<2x8xf32>, vector<8x32xf32>, vector<2x32xf32> -> vector<2x32xf32>
    %c0_61 = arith.constant 0 : index
    %c0_62 = arith.constant 0 : index
    %260 = vector.load %arg7[%c0_61, %c0_62] : memref<1x32xf32, #tpu.memory_space<vmem>>, vector<1x32xf32>
    %261 = vector.broadcast %260 : vector<1x32xf32> to vector<2x32xf32>
    %262 = arith.addf %259, %261 : vector<2x32xf32>
    %cst_63 = arith.constant 0.000000e+00 : f32
    %263 = vector.broadcast %cst_63 : f32 to vector<2x32xf32>
    %cst_64 = arith.constant dense<0.000000e+00> : vector<2x128xf32>
    %264 = tpu.matmul %262, %252, %cst_64 {dimension_numbers = #tpu.dot_dimension_numbers<[1], [0], [0], [1], [0, 0, 1, 1], [], []>} : vector<2x32xf32>, vector<32x128xf32>, vector<2x128xf32> -> vector<2x128xf32>
    %265 = vector.broadcast %253 : vector<1x128xf32> to vector<2x128xf32>
    %266 = arith.addf %264, %265 : vector<2x128xf32>
    %267 = vector.extract_strided_slice %266 {offsets = [0, 0], sizes = [2, 32], strides = [1, 1]} : vector<2x128xf32> to vector<2x32xf32>
    %268 = arith.negf %267 : vector<2x32xf32>
    %269 = math.exp %268 : vector<2x32xf32>
    %cst_65 = arith.constant 1.000000e+00 : f32
    %270 = vector.broadcast %cst_65 : f32 to vector<2x32xf32>
    %271 = arith.addf %270, %269 : vector<2x32xf32>
    %272 = arith.divf %270, %271 : vector<2x32xf32>
    %273 = vector.extract_strided_slice %266 {offsets = [0, 32], sizes = [2, 32], strides = [1, 1]} : vector<2x128xf32> to vector<2x32xf32>
    %274 = arith.negf %273 : vector<2x32xf32>
    %275 = math.exp %274 : vector<2x32xf32>
    %cst_66 = arith.constant 1.000000e+00 : f32
    %276 = vector.broadcast %cst_66 : f32 to vector<2x32xf32>
    %277 = arith.addf %276, %275 : vector<2x32xf32>
    %278 = arith.divf %276, %277 : vector<2x32xf32>
    %279 = vector.extract_strided_slice %266 {offsets = [0, 64], sizes = [2, 32], strides = [1, 1]} : vector<2x128xf32> to vector<2x32xf32>
    %280 = math.tanh %279 : vector<2x32xf32>
    %281 = vector.extract_strided_slice %266 {offsets = [0, 96], sizes = [2, 32], strides = [1, 1]} : vector<2x128xf32> to vector<2x32xf32>
    %282 = arith.negf %281 : vector<2x32xf32>
    %283 = math.exp %282 : vector<2x32xf32>
    %cst_67 = arith.constant 1.000000e+00 : f32
    %284 = vector.broadcast %cst_67 : f32 to vector<2x32xf32>
    %285 = arith.addf %284, %283 : vector<2x32xf32>
    %286 = arith.divf %284, %285 : vector<2x32xf32>
    %287 = arith.mulf %278, %263 : vector<2x32xf32>
    %288 = arith.mulf %272, %280 : vector<2x32xf32>
    %289 = arith.addf %287, %288 : vector<2x32xf32>
    %290 = math.tanh %289 : vector<2x32xf32>
    %291 = arith.mulf %286, %290 : vector<2x32xf32>
    %cst_68 = arith.constant dense<0.000000e+00> : vector<2x16xf32>
    %292 = tpu.matmul %291, %256, %cst_68 {dimension_numbers = #tpu.dot_dimension_numbers<[1], [0], [0], [1], [0, 0, 1, 1], [], []>} : vector<2x32xf32>, vector<32x16xf32>, vector<2x16xf32> -> vector<2x16xf32>
    %293 = vector.broadcast %257 : vector<1x16xf32> to vector<2x16xf32>
    %294 = arith.addf %292, %293 : vector<2x16xf32>
    %c0_69 = arith.constant 0 : index
    %c0_70 = arith.constant 0 : index
    %295 = vector.load %arg14[%c0_69, %c0_70] : memref<2x128xf32, #tpu.memory_space<vmem>>, vector<2x16xf32>
    tpu.vector_store %arg14[%c0_69, %c0_70], %294 {strides = array<i32>} : memref<2x128xf32, #tpu.memory_space<vmem>>, vector<2x16xf32>,
    %cst_71 = arith.constant dense<0.000000e+00> : vector<2x128xf32>
    %296 = tpu.matmul %291, %254, %cst_71 {dimension_numbers = #tpu.dot_dimension_numbers<[1], [0], [0], [1], [0, 0, 1, 1], [], []>} : vector<2x32xf32>, vector<32x128xf32>, vector<2x128xf32> -> vector<2x128xf32>
    %297 = vector.broadcast %255 : vector<1x128xf32> to vector<2x128xf32>
    %298 = arith.addf %296, %297 : vector<2x128xf32>
    %299 = vector.extract_strided_slice %298 {offsets = [0, 0], sizes = [2, 32], strides = [1, 1]} : vector<2x128xf32> to vector<2x32xf32>
    %300 = arith.negf %299 : vector<2x32xf32>
    %301 = math.exp %300 : vector<2x32xf32>
    %cst_72 = arith.constant 1.000000e+00 : f32
    %302 = vector.broadcast %cst_72 : f32 to vector<2x32xf32>
    %303 = arith.addf %302, %301 : vector<2x32xf32>
    %304 = arith.divf %302, %303 : vector<2x32xf32>
    %305 = vector.extract_strided_slice %298 {offsets = [0, 32], sizes = [2, 32], strides = [1, 1]} : vector<2x128xf32> to vector<2x32xf32>
    %306 = arith.negf %305 : vector<2x32xf32>
    %307 = math.exp %306 : vector<2x32xf32>
    %cst_73 = arith.constant 1.000000e+00 : f32
    %308 = vector.broadcast %cst_73 : f32 to vector<2x32xf32>
    %309 = arith.addf %308, %307 : vector<2x32xf32>
    %310 = arith.divf %308, %309 : vector<2x32xf32>
    %311 = vector.extract_strided_slice %298 {offsets = [0, 64], sizes = [2, 32], strides = [1, 1]} : vector<2x128xf32> to vector<2x32xf32>
    %312 = math.tanh %311 : vector<2x32xf32>
    %313 = vector.extract_strided_slice %298 {offsets = [0, 96], sizes = [2, 32], strides = [1, 1]} : vector<2x128xf32> to vector<2x32xf32>
    %314 = arith.negf %313 : vector<2x32xf32>
    %315 = math.exp %314 : vector<2x32xf32>
    %cst_74 = arith.constant 1.000000e+00 : f32
    %316 = vector.broadcast %cst_74 : f32 to vector<2x32xf32>
    %317 = arith.addf %316, %315 : vector<2x32xf32>
    %318 = arith.divf %316, %317 : vector<2x32xf32>
    %319 = arith.mulf %310, %289 : vector<2x32xf32>
    %320 = arith.mulf %304, %312 : vector<2x32xf32>
    %321 = arith.addf %319, %320 : vector<2x32xf32>
    %322 = math.tanh %321 : vector<2x32xf32>
    %323 = arith.mulf %318, %322 : vector<2x32xf32>
    %cst_75 = arith.constant dense<0.000000e+00> : vector<2x16xf32>
    %324 = tpu.matmul %323, %256, %cst_75 {dimension_numbers = #tpu.dot_dimension_numbers<[1], [0], [0], [1], [0, 0, 1, 1], [], []>} : vector<2x32xf32>, vector<32x16xf32>, vector<2x16xf32> -> vector<2x16xf32>
    %325 = vector.broadcast %257 : vector<1x16xf32> to vector<2x16xf32>
    %326 = arith.addf %324, %325 : vector<2x16xf32>
    %c0_76 = arith.constant 0 : index
    %c16 = arith.constant 16 : index
    %327 = vector.load %arg14[%c0_76, %c16] : memref<2x128xf32, #tpu.memory_space<vmem>>, vector<2x16xf32>
    tpu.vector_store %arg14[%c0_76, %c16], %326 {strides = array<i32>} : memref<2x128xf32, #tpu.memory_space<vmem>>, vector<2x16xf32>,
    %cst_77 = arith.constant dense<0.000000e+00> : vector<2x128xf32>
    %328 = tpu.matmul %323, %254, %cst_77 {dimension_numbers = #tpu.dot_dimension_numbers<[1], [0], [0], [1], [0, 0, 1, 1], [], []>} : vector<2x32xf32>, vector<32x128xf32>, vector<2x128xf32> -> vector<2x128xf32>
    %329 = vector.broadcast %255 : vector<1x128xf32> to vector<2x128xf32>
    %330 = arith.addf %328, %329 : vector<2x128xf32>
    %331 = vector.extract_strided_slice %330 {offsets = [0, 0], sizes = [2, 32], strides = [1, 1]} : vector<2x128xf32> to vector<2x32xf32>
    %332 = arith.negf %331 : vector<2x32xf32>
    %333 = math.exp %332 : vector<2x32xf32>
    %cst_78 = arith.constant 1.000000e+00 : f32
    %334 = vector.broadcast %cst_78 : f32 to vector<2x32xf32>
    %335 = arith.addf %334, %333 : vector<2x32xf32>
    %336 = arith.divf %334, %335 : vector<2x32xf32>
    %337 = vector.extract_strided_slice %330 {offsets = [0, 32], sizes = [2, 32], strides = [1, 1]} : vector<2x128xf32> to vector<2x32xf32>
    %338 = arith.negf %337 : vector<2x32xf32>
    %339 = math.exp %338 : vector<2x32xf32>
    %cst_79 = arith.constant 1.000000e+00 : f32
    %340 = vector.broadcast %cst_79 : f32 to vector<2x32xf32>
    %341 = arith.addf %340, %339 : vector<2x32xf32>
    %342 = arith.divf %340, %341 : vector<2x32xf32>
    %343 = vector.extract_strided_slice %330 {offsets = [0, 64], sizes = [2, 32], strides = [1, 1]} : vector<2x128xf32> to vector<2x32xf32>
    %344 = math.tanh %343 : vector<2x32xf32>
    %345 = vector.extract_strided_slice %330 {offsets = [0, 96], sizes = [2, 32], strides = [1, 1]} : vector<2x128xf32> to vector<2x32xf32>
    %346 = arith.negf %345 : vector<2x32xf32>
    %347 = math.exp %346 : vector<2x32xf32>
    %cst_80 = arith.constant 1.000000e+00 : f32
    %348 = vector.broadcast %cst_80 : f32 to vector<2x32xf32>
    %349 = arith.addf %348, %347 : vector<2x32xf32>
    %350 = arith.divf %348, %349 : vector<2x32xf32>
    %351 = arith.mulf %342, %321 : vector<2x32xf32>
    %352 = arith.mulf %336, %344 : vector<2x32xf32>
    %353 = arith.addf %351, %352 : vector<2x32xf32>
    %354 = math.tanh %353 : vector<2x32xf32>
    %355 = arith.mulf %350, %354 : vector<2x32xf32>
    %cst_81 = arith.constant dense<0.000000e+00> : vector<2x16xf32>
    %356 = tpu.matmul %355, %256, %cst_81 {dimension_numbers = #tpu.dot_dimension_numbers<[1], [0], [0], [1], [0, 0, 1, 1], [], []>} : vector<2x32xf32>, vector<32x16xf32>, vector<2x16xf32> -> vector<2x16xf32>
    %357 = vector.broadcast %257 : vector<1x16xf32> to vector<2x16xf32>
    %358 = arith.addf %356, %357 : vector<2x16xf32>
    %c0_82 = arith.constant 0 : index
    %c32 = arith.constant 32 : index
    %359 = vector.load %arg14[%c0_82, %c32] : memref<2x128xf32, #tpu.memory_space<vmem>>, vector<2x16xf32>
    tpu.vector_store %arg14[%c0_82, %c32], %358 {strides = array<i32>} : memref<2x128xf32, #tpu.memory_space<vmem>>, vector<2x16xf32>,
    %cst_83 = arith.constant dense<0.000000e+00> : vector<2x128xf32>
    %360 = tpu.matmul %355, %254, %cst_83 {dimension_numbers = #tpu.dot_dimension_numbers<[1], [0], [0], [1], [0, 0, 1, 1], [], []>} : vector<2x32xf32>, vector<32x128xf32>, vector<2x128xf32> -> vector<2x128xf32>
    %361 = vector.broadcast %255 : vector<1x128xf32> to vector<2x128xf32>
    %362 = arith.addf %360, %361 : vector<2x128xf32>
    %363 = vector.extract_strided_slice %362 {offsets = [0, 0], sizes = [2, 32], strides = [1, 1]} : vector<2x128xf32> to vector<2x32xf32>
    %364 = arith.negf %363 : vector<2x32xf32>
    %365 = math.exp %364 : vector<2x32xf32>
    %cst_84 = arith.constant 1.000000e+00 : f32
    %366 = vector.broadcast %cst_84 : f32 to vector<2x32xf32>
    %367 = arith.addf %366, %365 : vector<2x32xf32>
    %368 = arith.divf %366, %367 : vector<2x32xf32>
    %369 = vector.extract_strided_slice %362 {offsets = [0, 32], sizes = [2, 32], strides = [1, 1]} : vector<2x128xf32> to vector<2x32xf32>
    %370 = arith.negf %369 : vector<2x32xf32>
    %371 = math.exp %370 : vector<2x32xf32>
    %cst_85 = arith.constant 1.000000e+00 : f32
    %372 = vector.broadcast %cst_85 : f32 to vector<2x32xf32>
    %373 = arith.addf %372, %371 : vector<2x32xf32>
    %374 = arith.divf %372, %373 : vector<2x32xf32>
    %375 = vector.extract_strided_slice %362 {offsets = [0, 64], sizes = [2, 32], strides = [1, 1]} : vector<2x128xf32> to vector<2x32xf32>
    %376 = math.tanh %375 : vector<2x32xf32>
    %377 = vector.extract_strided_slice %362 {offsets = [0, 96], sizes = [2, 32], strides = [1, 1]} : vector<2x128xf32> to vector<2x32xf32>
    %378 = arith.negf %377 : vector<2x32xf32>
    %379 = math.exp %378 : vector<2x32xf32>
    %cst_86 = arith.constant 1.000000e+00 : f32
    %380 = vector.broadcast %cst_86 : f32 to vector<2x32xf32>
    %381 = arith.addf %380, %379 : vector<2x32xf32>
    %382 = arith.divf %380, %381 : vector<2x32xf32>
    %383 = arith.mulf %374, %353 : vector<2x32xf32>
    %384 = arith.mulf %368, %376 : vector<2x32xf32>
    %385 = arith.addf %383, %384 : vector<2x32xf32>
    %386 = math.tanh %385 : vector<2x32xf32>
    %387 = arith.mulf %382, %386 : vector<2x32xf32>
    %cst_87 = arith.constant dense<0.000000e+00> : vector<2x16xf32>
    %388 = tpu.matmul %387, %256, %cst_87 {dimension_numbers = #tpu.dot_dimension_numbers<[1], [0], [0], [1], [0, 0, 1, 1], [], []>} : vector<2x32xf32>, vector<32x16xf32>, vector<2x16xf32> -> vector<2x16xf32>
    %389 = vector.broadcast %257 : vector<1x16xf32> to vector<2x16xf32>
    %390 = arith.addf %388, %389 : vector<2x16xf32>
    %c0_88 = arith.constant 0 : index
    %c48 = arith.constant 48 : index
    %391 = vector.load %arg14[%c0_88, %c48] : memref<2x128xf32, #tpu.memory_space<vmem>>, vector<2x16xf32>
    tpu.vector_store %arg14[%c0_88, %c48], %390 {strides = array<i32>} : memref<2x128xf32, #tpu.memory_space<vmem>>, vector<2x16xf32>,
    %cst_89 = arith.constant dense<0.000000e+00> : vector<2x128xf32>
    %392 = tpu.matmul %387, %254, %cst_89 {dimension_numbers = #tpu.dot_dimension_numbers<[1], [0], [0], [1], [0, 0, 1, 1], [], []>} : vector<2x32xf32>, vector<32x128xf32>, vector<2x128xf32> -> vector<2x128xf32>
    %393 = vector.broadcast %255 : vector<1x128xf32> to vector<2x128xf32>
    %394 = arith.addf %392, %393 : vector<2x128xf32>
    %395 = vector.extract_strided_slice %394 {offsets = [0, 0], sizes = [2, 32], strides = [1, 1]} : vector<2x128xf32> to vector<2x32xf32>
    %396 = arith.negf %395 : vector<2x32xf32>
    %397 = math.exp %396 : vector<2x32xf32>
    %cst_90 = arith.constant 1.000000e+00 : f32
    %398 = vector.broadcast %cst_90 : f32 to vector<2x32xf32>
    %399 = arith.addf %398, %397 : vector<2x32xf32>
    %400 = arith.divf %398, %399 : vector<2x32xf32>
    %401 = vector.extract_strided_slice %394 {offsets = [0, 32], sizes = [2, 32], strides = [1, 1]} : vector<2x128xf32> to vector<2x32xf32>
    %402 = arith.negf %401 : vector<2x32xf32>
    %403 = math.exp %402 : vector<2x32xf32>
    %cst_91 = arith.constant 1.000000e+00 : f32
    %404 = vector.broadcast %cst_91 : f32 to vector<2x32xf32>
    %405 = arith.addf %404, %403 : vector<2x32xf32>
    %406 = arith.divf %404, %405 : vector<2x32xf32>
    %407 = vector.extract_strided_slice %394 {offsets = [0, 64], sizes = [2, 32], strides = [1, 1]} : vector<2x128xf32> to vector<2x32xf32>
    %408 = math.tanh %407 : vector<2x32xf32>
    %409 = vector.extract_strided_slice %394 {offsets = [0, 96], sizes = [2, 32], strides = [1, 1]} : vector<2x128xf32> to vector<2x32xf32>
    %410 = arith.negf %409 : vector<2x32xf32>
    %411 = math.exp %410 : vector<2x32xf32>
    %cst_92 = arith.constant 1.000000e+00 : f32
    %412 = vector.broadcast %cst_92 : f32 to vector<2x32xf32>
    %413 = arith.addf %412, %411 : vector<2x32xf32>
    %414 = arith.divf %412, %413 : vector<2x32xf32>
    %415 = arith.mulf %406, %385 : vector<2x32xf32>
    %416 = arith.mulf %400, %408 : vector<2x32xf32>
    %417 = arith.addf %415, %416 : vector<2x32xf32>
    %418 = math.tanh %417 : vector<2x32xf32>
    %419 = arith.mulf %414, %418 : vector<2x32xf32>
    %cst_93 = arith.constant dense<0.000000e+00> : vector<2x16xf32>
    %420 = tpu.matmul %419, %256, %cst_93 {dimension_numbers = #tpu.dot_dimension_numbers<[1], [0], [0], [1], [0, 0, 1, 1], [], []>} : vector<2x32xf32>, vector<32x16xf32>, vector<2x16xf32> -> vector<2x16xf32>
    %421 = vector.broadcast %257 : vector<1x16xf32> to vector<2x16xf32>
    %422 = arith.addf %420, %421 : vector<2x16xf32>
    %c0_94 = arith.constant 0 : index
    %c64 = arith.constant 64 : index
    %423 = vector.load %arg14[%c0_94, %c64] : memref<2x128xf32, #tpu.memory_space<vmem>>, vector<2x16xf32>
    tpu.vector_store %arg14[%c0_94, %c64], %422 {strides = array<i32>} : memref<2x128xf32, #tpu.memory_space<vmem>>, vector<2x16xf32>,
    %cst_95 = arith.constant dense<0.000000e+00> : vector<2x128xf32>
    %424 = tpu.matmul %419, %254, %cst_95 {dimension_numbers = #tpu.dot_dimension_numbers<[1], [0], [0], [1], [0, 0, 1, 1], [], []>} : vector<2x32xf32>, vector<32x128xf32>, vector<2x128xf32> -> vector<2x128xf32>
    %425 = vector.broadcast %255 : vector<1x128xf32> to vector<2x128xf32>
    %426 = arith.addf %424, %425 : vector<2x128xf32>
    %427 = vector.extract_strided_slice %426 {offsets = [0, 0], sizes = [2, 32], strides = [1, 1]} : vector<2x128xf32> to vector<2x32xf32>
    %428 = arith.negf %427 : vector<2x32xf32>
    %429 = math.exp %428 : vector<2x32xf32>
    %cst_96 = arith.constant 1.000000e+00 : f32
    %430 = vector.broadcast %cst_96 : f32 to vector<2x32xf32>
    %431 = arith.addf %430, %429 : vector<2x32xf32>
    %432 = arith.divf %430, %431 : vector<2x32xf32>
    %433 = vector.extract_strided_slice %426 {offsets = [0, 32], sizes = [2, 32], strides = [1, 1]} : vector<2x128xf32> to vector<2x32xf32>
    %434 = arith.negf %433 : vector<2x32xf32>
    %435 = math.exp %434 : vector<2x32xf32>
    %cst_97 = arith.constant 1.000000e+00 : f32
    %436 = vector.broadcast %cst_97 : f32 to vector<2x32xf32>
    %437 = arith.addf %436, %435 : vector<2x32xf32>
    %438 = arith.divf %436, %437 : vector<2x32xf32>
    %439 = vector.extract_strided_slice %426 {offsets = [0, 64], sizes = [2, 32], strides = [1, 1]} : vector<2x128xf32> to vector<2x32xf32>
    %440 = math.tanh %439 : vector<2x32xf32>
    %441 = vector.extract_strided_slice %426 {offsets = [0, 96], sizes = [2, 32], strides = [1, 1]} : vector<2x128xf32> to vector<2x32xf32>
    %442 = arith.negf %441 : vector<2x32xf32>
    %443 = math.exp %442 : vector<2x32xf32>
    %cst_98 = arith.constant 1.000000e+00 : f32
    %444 = vector.broadcast %cst_98 : f32 to vector<2x32xf32>
    %445 = arith.addf %444, %443 : vector<2x32xf32>
    %446 = arith.divf %444, %445 : vector<2x32xf32>
    %447 = arith.mulf %438, %417 : vector<2x32xf32>
    %448 = arith.mulf %432, %440 : vector<2x32xf32>
    %449 = arith.addf %447, %448 : vector<2x32xf32>
    %450 = math.tanh %449 : vector<2x32xf32>
    %451 = arith.mulf %446, %450 : vector<2x32xf32>
    %cst_99 = arith.constant dense<0.000000e+00> : vector<2x16xf32>
    %452 = tpu.matmul %451, %256, %cst_99 {dimension_numbers = #tpu.dot_dimension_numbers<[1], [0], [0], [1], [0, 0, 1, 1], [], []>} : vector<2x32xf32>, vector<32x16xf32>, vector<2x16xf32> -> vector<2x16xf32>
    %453 = vector.broadcast %257 : vector<1x16xf32> to vector<2x16xf32>
    %454 = arith.addf %452, %453 : vector<2x16xf32>
    %c0_100 = arith.constant 0 : index
    %c80 = arith.constant 80 : index
    %455 = vector.load %arg14[%c0_100, %c80] : memref<2x128xf32, #tpu.memory_space<vmem>>, vector<2x16xf32>
    tpu.vector_store %arg14[%c0_100, %c80], %454 {strides = array<i32>} : memref<2x128xf32, #tpu.memory_space<vmem>>, vector<2x16xf32>,
    %cst_101 = arith.constant dense<0.000000e+00> : vector<2x128xf32>
    %456 = tpu.matmul %451, %254, %cst_101 {dimension_numbers = #tpu.dot_dimension_numbers<[1], [0], [0], [1], [0, 0, 1, 1], [], []>} : vector<2x32xf32>, vector<32x128xf32>, vector<2x128xf32> -> vector<2x128xf32>
    %457 = vector.broadcast %255 : vector<1x128xf32> to vector<2x128xf32>
    %458 = arith.addf %456, %457 : vector<2x128xf32>
    %459 = vector.extract_strided_slice %458 {offsets = [0, 0], sizes = [2, 32], strides = [1, 1]} : vector<2x128xf32> to vector<2x32xf32>
    %460 = arith.negf %459 : vector<2x32xf32>
    %461 = math.exp %460 : vector<2x32xf32>
    %cst_102 = arith.constant 1.000000e+00 : f32
    %462 = vector.broadcast %cst_102 : f32 to vector<2x32xf32>
    %463 = arith.addf %462, %461 : vector<2x32xf32>
    %464 = arith.divf %462, %463 : vector<2x32xf32>
    %465 = vector.extract_strided_slice %458 {offsets = [0, 32], sizes = [2, 32], strides = [1, 1]} : vector<2x128xf32> to vector<2x32xf32>
    %466 = arith.negf %465 : vector<2x32xf32>
    %467 = math.exp %466 : vector<2x32xf32>
    %cst_103 = arith.constant 1.000000e+00 : f32
    %468 = vector.broadcast %cst_103 : f32 to vector<2x32xf32>
    %469 = arith.addf %468, %467 : vector<2x32xf32>
    %470 = arith.divf %468, %469 : vector<2x32xf32>
    %471 = vector.extract_strided_slice %458 {offsets = [0, 64], sizes = [2, 32], strides = [1, 1]} : vector<2x128xf32> to vector<2x32xf32>
    %472 = math.tanh %471 : vector<2x32xf32>
    %473 = vector.extract_strided_slice %458 {offsets = [0, 96], sizes = [2, 32], strides = [1, 1]} : vector<2x128xf32> to vector<2x32xf32>
    %474 = arith.negf %473 : vector<2x32xf32>
    %475 = math.exp %474 : vector<2x32xf32>
    %cst_104 = arith.constant 1.000000e+00 : f32
    %476 = vector.broadcast %cst_104 : f32 to vector<2x32xf32>
    %477 = arith.addf %476, %475 : vector<2x32xf32>
    %478 = arith.divf %476, %477 : vector<2x32xf32>
    %479 = arith.mulf %470, %449 : vector<2x32xf32>
    %480 = arith.mulf %464, %472 : vector<2x32xf32>
    %481 = arith.addf %479, %480 : vector<2x32xf32>
    %482 = math.tanh %481 : vector<2x32xf32>
    %483 = arith.mulf %478, %482 : vector<2x32xf32>
    %cst_105 = arith.constant dense<0.000000e+00> : vector<2x16xf32>
    %484 = tpu.matmul %483, %256, %cst_105 {dimension_numbers = #tpu.dot_dimension_numbers<[1], [0], [0], [1], [0, 0, 1, 1], [], []>} : vector<2x32xf32>, vector<32x16xf32>, vector<2x16xf32> -> vector<2x16xf32>
    %485 = vector.broadcast %257 : vector<1x16xf32> to vector<2x16xf32>
    %486 = arith.addf %484, %485 : vector<2x16xf32>
    %c0_106 = arith.constant 0 : index
    %c96 = arith.constant 96 : index
    %487 = vector.load %arg14[%c0_106, %c96] : memref<2x128xf32, #tpu.memory_space<vmem>>, vector<2x16xf32>
    tpu.vector_store %arg14[%c0_106, %c96], %486 {strides = array<i32>} : memref<2x128xf32, #tpu.memory_space<vmem>>, vector<2x16xf32>,
    %cst_107 = arith.constant dense<0.000000e+00> : vector<2x128xf32>
    %488 = tpu.matmul %483, %254, %cst_107 {dimension_numbers = #tpu.dot_dimension_numbers<[1], [0], [0], [1], [0, 0, 1, 1], [], []>} : vector<2x32xf32>, vector<32x128xf32>, vector<2x128xf32> -> vector<2x128xf32>
    %489 = vector.broadcast %255 : vector<1x128xf32> to vector<2x128xf32>
    %490 = arith.addf %488, %489 : vector<2x128xf32>
    %491 = vector.extract_strided_slice %490 {offsets = [0, 0], sizes = [2, 32], strides = [1, 1]} : vector<2x128xf32> to vector<2x32xf32>
    %492 = arith.negf %491 : vector<2x32xf32>
    %493 = math.exp %492 : vector<2x32xf32>
    %cst_108 = arith.constant 1.000000e+00 : f32
    %494 = vector.broadcast %cst_108 : f32 to vector<2x32xf32>
    %495 = arith.addf %494, %493 : vector<2x32xf32>
    %496 = arith.divf %494, %495 : vector<2x32xf32>
    %497 = vector.extract_strided_slice %490 {offsets = [0, 32], sizes = [2, 32], strides = [1, 1]} : vector<2x128xf32> to vector<2x32xf32>
    %498 = arith.negf %497 : vector<2x32xf32>
    %499 = math.exp %498 : vector<2x32xf32>
    %cst_109 = arith.constant 1.000000e+00 : f32
    %500 = vector.broadcast %cst_109 : f32 to vector<2x32xf32>
    %501 = arith.addf %500, %499 : vector<2x32xf32>
    %502 = arith.divf %500, %501 : vector<2x32xf32>
    %503 = vector.extract_strided_slice %490 {offsets = [0, 64], sizes = [2, 32], strides = [1, 1]} : vector<2x128xf32> to vector<2x32xf32>
    %504 = math.tanh %503 : vector<2x32xf32>
    %505 = vector.extract_strided_slice %490 {offsets = [0, 96], sizes = [2, 32], strides = [1, 1]} : vector<2x128xf32> to vector<2x32xf32>
    %506 = arith.negf %505 : vector<2x32xf32>
    %507 = math.exp %506 : vector<2x32xf32>
    %cst_110 = arith.constant 1.000000e+00 : f32
    %508 = vector.broadcast %cst_110 : f32 to vector<2x32xf32>
    %509 = arith.addf %508, %507 : vector<2x32xf32>
    %510 = arith.divf %508, %509 : vector<2x32xf32>
    %511 = arith.mulf %502, %481 : vector<2x32xf32>
    %512 = arith.mulf %496, %504 : vector<2x32xf32>
    %513 = arith.addf %511, %512 : vector<2x32xf32>
    %514 = math.tanh %513 : vector<2x32xf32>
    %515 = arith.mulf %510, %514 : vector<2x32xf32>
    %cst_111 = arith.constant dense<0.000000e+00> : vector<2x16xf32>
    %516 = tpu.matmul %515, %256, %cst_111 {dimension_numbers = #tpu.dot_dimension_numbers<[1], [0], [0], [1], [0, 0, 1, 1], [], []>} : vector<2x32xf32>, vector<32x16xf32>, vector<2x16xf32> -> vector<2x16xf32>
    %517 = vector.broadcast %257 : vector<1x16xf32> to vector<2x16xf32>
    %518 = arith.addf %516, %517 : vector<2x16xf32>
    %c0_112 = arith.constant 0 : index
    %c112 = arith.constant 112 : index
    %519 = vector.load %arg14[%c0_112, %c112] : memref<2x128xf32, #tpu.memory_space<vmem>>, vector<2x16xf32>
    tpu.vector_store %arg14[%c0_112, %c112], %518 {strides = array<i32>} : memref<2x128xf32, #tpu.memory_space<vmem>>, vector<2x16xf32>,
    return
  }
}

</mosaic_0001>

<bundles_post_ra>
// kernel: lstm_autoencoder_forward.1
= control target key start
LH: loop header
LB: loop body
LE: loop exit
PB: predicated region body
PF: predicated region fallthrough
CT: control target
= control target key end

     0   :  { %v3204_v0 = vmov 0.0   ;;  %vm3205_vm0 = vmmov 0   ;;  %vm51_vm1 = vcmask 130048   ;;  %s3206_s28 = smov 64   ;;  %vm138_vm2 = vcmask 261120   ;;  %s3211_s15 = smov 96   ;;  %s3825_s1 = inlined_call_operand.vmem [shape: f32[16,128], index: 1, kind: input, shape index: {}]   ;;  %s3826_s2 = inlined_call_operand.vmem [shape: f32[32,128], index: 2, kind: input, shape index: {}]   ;;  %s3827_s0 = inlined_call_operand.vmem [shape: f32[16,16], index: 0, kind: input, shape index: {}]   ;;  %s3828_s3 = inlined_call_operand.vmem [shape: f32[1,128], index: 3, kind: input, shape index: {}]   ;;  %s3829_s4 = inlined_call_operand.vmem [shape: f32[32,8], index: 4, kind: input, shape index: {}]   ;;  %s3830_s6 = inlined_call_operand.vmem [shape: f32[8,32], index: 6, kind: input, shape index: {}]   ;;  %s3831_s5 = inlined_call_operand.vmem [shape: f32[1,8], index: 5, kind: input, shape index: {}]   ;;  %s3832_s8 = inlined_call_operand.vmem [shape: f32[32,128], index: 8, kind: input, shape index: {}]   ;;  %s3833_s7 = inlined_call_operand.vmem [shape: f32[1,32], index: 7, kind: input, shape index: {}]   ;;  %s3834_s9 = inlined_call_operand.vmem [shape: f32[1,128], index: 9, kind: input, shape index: {}]   ;;  %s3835_s12 = inlined_call_operand.vmem [shape: f32[32,16], index: 12, kind: input, shape index: {}]   ;;  %s3836_s10 = inlined_call_operand.vmem [shape: f32[32,128], index: 10, kind: input, shape index: {}]   ;;  %s3837_s13 = inlined_call_operand.vmem [shape: f32[1,16], index: 13, kind: input, shape index: {}]   ;;  %s3838_s11 = inlined_call_operand.vmem [shape: f32[1,128], index: 11, kind: input, shape index: {}]   ;;  %s3839_s14 = inlined_call_operand.vmem [shape: f32[2,128], index: 14, kind: output, shape index: {}]  }
   0x1   :  { %2787 = vmatprep.subr.mxu1 %v3204_v0  ;;  %v50_v1 = vld [vmem:[%s3825_s1 + $0x8] sm:$0xff]  ;;  %v3295_v2 = vld [vmem:[%s3826_s2 + $0x18] sm:$0xff]  ;;  %v49_v3 = vld [vmem:[%s3825_s1] sm:$0xff]  ;;  %2795 = vmatprep.mubr.msk.f32.mxu1 %vm3205_vm0, %v3204_v0  ;;  %vm1105_vm3 = vcmask 64512   ;;  %vm1363_vm4 = vcmask 123904   ;;  %vm1544_vm5 = vcmask 255104  }
   0x2   :  { %2780 = vmatprep.subr.mxu0 %v50_v1  ;;  %2788 = vmatpush3.msra.mxu1 %v3295_v2  ;;  %v3306_v4 = vld [vmem:[%s3826_s2 + $0x10] sm:$0xff]  ;;  %v47_v5 = vld [vmem:[%s3827_s0] sm:$0xff]  ;;  %v48_v6 = vld [vmem:[%s3827_s0 + $0x8] sm:$0xff]  ;;  %vm1719_vm6 = vcmask 386304   ;;  %vm1894_vm7 = vcmask 517504   ;;  %vm2069_vm8 = vcmask 648704  }
   0x3   :  { %2781 = vmatpush3.msra.mxu0 %v50_v1  ;;  %2789 = vmatprep.subr.mxu1 %v3204_v0  ;;  %v3319_v7 = vld [vmem:[%s3826_s2 + $0x8] sm:$0xff]  ;;  %v3325_v8 = vld [vmem:[%s3826_s2] sm:$0xff]  ;;  %s3210_s2 = smov 80   ;;  %vm2244_vm9 = vcmask 779904   ;;  %vm2419_vm10 = vcmask 911104   ;;  %s3212_s21 = smov 112  }
   0x4   :  { %2782 = vmatprep.subr.mxu0 %v49_v3  ;;  %2790 = vmatpush3.msra.mxu1 %v3306_v4  ;;  %v3360_v11 = vld [vmem:[%s3828_s3] ss:$0 sm:$0xff]  ;;  %s3207_s3 = smov 32   ;;  %vm2594_vm11 = vcmask 1042304  }
   0x5   :  { %2783 = vmatpush3.msra.mxu0 %v49_v3  ;;  %2784 = vmatprep.mubr.msk.f32.mxu0 %vm51_vm1, %v47_v5 }
   0x6   :  { %2791 = vmatprep.subr.mxu1 %v3204_v0  ;;  %2785 = vmatmul.mubr.msk.f32.vlgmr.msra.gmra.mxu0 %vm51_vm1, %v48_v6 }
   0x7   :  { %2792 = vmatpush3.msra.mxu1 %v3319_v7  ;;  %2798 = vmatprep.subr.mxu0 %v3204_v0 }
   0x8   :  { %2793 = vmatprep.subr.mxu1 %v3204_v0  ;;  %2799 = vmatpush3.msra.mxu0 %v3295_v2 }
   0x9   :  { %2794 = vmatpush3.msra.mxu1 %v3325_v8  ;;  %2800 = vmatprep.subr.mxu0 %v3204_v0 }
   0xa   :  { %2796 = vmatmul.mubr.f32.vlgmr.msra.gmra.mxu1 %v3204_v0  ;;  %2801 = vmatpush3.msra.mxu0 %v3306_v4 }
   0xb   :  { %2802 = vmatprep.subr.mxu0 %v3204_v0  ;;  %2806 = vmatprep.mubr.msk.f32.mxu0 %vm3205_vm0, %v3204_v0 }
   0xc   :  { %2803 = vmatpush3.msra.mxu0 %v3319_v7  ;;  %2809 = vmatprep.subr.mxu1 %v3204_v0 }
   0xd   :  { %2804 = vmatprep.subr.mxu0 %v3204_v0  ;;  %2810 = vmatpush3.msra.mxu1 %v3295_v2 }
   0xe   :  { %2805 = vmatpush3.msra.mxu0 %v3325_v8  ;;  %2811 = vmatprep.subr.mxu1 %v3204_v0 }
   0xf   :  { %2812 = vmatpush3.msra.mxu1 %v3306_v4  ;;  %2817 = vmatprep.mubr.msk.f32.mxu1 %vm3205_vm0, %v3204_v0 }
  0x10   :  { %2813 = vmatprep.subr.mxu1 %v3204_v0  ;;  %2820 = vmatprep.subr.mxu0 %v3204_v0 }
  0x11   :  { %2814 = vmatpush3.msra.mxu1 %v3319_v7 }
  0x12   :  { %2815 = vmatprep.subr.mxu1 %v3204_v0 }
  0x13   :  { %2816 = vmatpush3.msra.mxu1 %v3325_v8 }
  0x14   :  { %2831 = vmatprep.subr.mxu1 %v3204_v0 }
  0xc6   :  { %v3353_v9 = vpop.f32.mrf.mxu0 }
  0xc8   :  { %v3355_v10 = vpop.f32.mrf.mxu0 }
  0xca   :  { %v208_v12 = vpop.f32.mrf.mxu1 }
  0xcb   :  { %v212_v13 = vadd.f32 %v208_v12, %v3355_v10 }
  0xcc   :  { %v2797_v14 = vpop.f32.mrf.mxu1 }
  0xcd   :  { %v219_v15 = vadd.f32 %v3360_v11, %v212_v13 }
  0xcf   :  { %3076 = vtanh.f32 %v219_v15  ;;  %v2603_v17 = vmul.f32 -1.442695, %v219_v15 }
  0xd1   :  { %3078 = vpow2.f32 %v2603_v17 }
  0xdc   :  { %v3077_v16 = vpop.eup %3076 }
  0xdd   :  { %229 = vrot.lane.b32.xlu0 %v3077_v16, %s3206_s28 }
  0xde   :  { %v3079_v18 = vpop.eup %3078 }
  0xdf   :  { %v223_v19 = vadd.f32 1.0, %v3079_v18 }
  0xe1   :  { %3080 = vrcp.f32 %v223_v19 }
  0xee   :  { %v3081_v20 = vpop.eup %3080 }
  0xef   :  { %v227_v23 = vmul.f32 0.0, %v3081_v20 }
 0x14f   :  { %v230_v21 = vpop.permute.xlu0 %229 }
 0x150   :  { %v232_v22 = vmul.f32 %v3081_v20, %v230_v21 }
 0x152   :  { %234 = vrot.lane.b32.xlu0 %v232_v22, %s3207_s3 }
 0x1c4   :  { %v235_v24 = vpop.permute.xlu0 %234 }
 0x1c5   :  { %v237_v25 = vadd.f32 %v235_v24, %v227_v23 }
 0x1c7   :  { %3082 = vtanh.f32 %v237_v25  ;;  %v332_v42 = vrot.slane %v237_v25, 6 }
 0x1d4   :  { %v3083_v26 = vpop.eup %3082 }
 0x1d5   :  { %240 = vrot.lane.b32.xlu1 %v3083_v26, %s3206_s28 }
 0x247   :  { %v241_v27 = vpop.permute.xlu1 %240 }
 0x248   :  { %v243_v28 = vmul.f32 %v3081_v20, %v241_v27 }
 0x24a   :  { %245 = vrot.lane.b32.xlu1 %v243_v28, %s3207_s3 }
 0x2bc   :  { %v246_v29 = vpop.permute.xlu1 %245 }
 0x2bd   :  { %2807 = vmatmul.mubr.msk.f32.vlgmr.msra.gmra.mxu0 %vm138_vm2, %v246_v29 }
 0x2be   :  { %2821 = vmatpush3.msra.mxu0 %v3295_v2  ;;  %2828 = vmatprep.mubr.msk.f32.mxu0 %vm3205_vm0, %v3204_v0 }
 0x2bf   :  { %2822 = vmatprep.subr.mxu0 %v3204_v0 }
 0x2c0   :  { %2823 = vmatpush3.msra.mxu0 %v3306_v4 }
 0x2c1   :  { %2824 = vmatprep.subr.mxu0 %v3204_v0 }
 0x2c2   :  { %2825 = vmatpush3.msra.mxu0 %v3319_v7 }
 0x2c3   :  { %2826 = vmatprep.subr.mxu0 %v3204_v0 }
 0x2c4   :  { %2827 = vmatpush3.msra.mxu0 %v3325_v8 }
 0x2c5   :  { %2842 = vmatprep.subr.mxu0 %v3204_v0 }
 0x37d   :  { %v315_v30 = vpop.f32.mrf.mxu0 }
 0x37e   :  { %v320_v31 = vrot.slane %v315_v30, 6 }
 0x37f   :  { %v2808_v32 = vpop.f32.mrf.mxu0 }
 0x380   :  { %v322_v33 = vadd.f32 %v320_v31, %v3355_v10 }
 0x382   :  { %v323_v34 = vadd.f32 %v3360_v11, %v322_v33 }
 0x384   :  { %3084 = vtanh.f32 %v323_v34  ;;  %v2605_v36 = vmul.f32 -1.442695, %v323_v34 }
 0x386   :  { %3086 = vpow2.f32 %v2605_v36 }
 0x391   :  { %v3085_v35 = vpop.eup %3084 }
 0x392   :  { %336 = vrot.lane.b32.xlu0 %v3085_v35, %s3206_s28 }
 0x393   :  { %v3087_v37 = vpop.eup %3086 }
 0x394   :  { %v327_v38 = vadd.f32 1.0, %v3087_v37 }
 0x396   :  { %3088 = vrcp.f32 %v327_v38 }
 0x3a3   :  { %v3089_v39 = vpop.eup %3088 }
 0x3a4   :  { %v334_v43 = vmul.f32 %v3089_v39, %v332_v42 }
 0x404   :  { %v337_v40 = vpop.permute.xlu0 %336 }
 0x405   :  { %v339_v41 = vmul.f32 %v3089_v39, %v337_v40 }
 0x407   :  { %341 = vrot.lane.b32.xlu1 %v339_v41, %s3207_s3 }
 0x479   :  { %v342_v44 = vpop.permute.xlu1 %341 }
 0x47a   :  { %v344_v45 = vadd.f32 %v342_v44, %v334_v43 }
 0x47c   :  { %3090 = vtanh.f32 %v344_v45  ;;  %v440_v63 = vrot.slane %v344_v45, 6 }
 0x489   :  { %v3091_v46 = vpop.eup %3090 }
 0x48a   :  { %347 = vrot.lane.b32.xlu0 %v3091_v46, %s3206_s28 }
 0x4fc   :  { %v348_v47 = vpop.permute.xlu0 %347 }
 0x4fd   :  { %v350_v48 = vmul.f32 %v3089_v39, %v348_v47 }
 0x4ff   :  { %v352_v49 = vrot.slane %v350_v48, 2 }
 0x501   :  { %353 = vrot.lane.b32.xlu1 %v352_v49, %s3207_s3 }
 0x573   :  { %v354_v50 = vpop.permute.xlu1 %353 }
 0x574   :  { %2818 = vmatmul.mubr.msk.f32.vlgmr.msra.gmra.mxu1 %vm138_vm2, %v354_v50 }
 0x575   :  { %2832 = vmatpush3.msra.mxu1 %v3295_v2  ;;  %2839 = vmatprep.mubr.msk.f32.mxu1 %vm3205_vm0, %v3204_v0 }
 0x576   :  { %2833 = vmatprep.subr.mxu1 %v3204_v0 }
 0x577   :  { %2834 = vmatpush3.msra.mxu1 %v3306_v4 }
 0x578   :  { %2835 = vmatprep.subr.mxu1 %v3204_v0 }
 0x579   :  { %2836 = vmatpush3.msra.mxu1 %v3319_v7 }
 0x57a   :  { %2837 = vmatprep.subr.mxu1 %v3204_v0 }
 0x57b   :  { %2838 = vmatpush3.msra.mxu1 %v3325_v8 }
 0x57c   :  { %2853 = vmatprep.subr.mxu1 %v3204_v0 }
 0x634   :  { %v423_v51 = vpop.f32.mrf.mxu1 }
 0x635   :  { %v428_v52 = vrot.slane %v423_v51, 4 }
 0x636   :  { %v2819_v53 = vpop.f32.mrf.mxu1 }
 0x637   :  { %v430_v54 = vadd.f32 %v428_v52, %v3355_v10 }
 0x639   :  { %v431_v55 = vadd.f32 %v3360_v11, %v430_v54 }
 0x63b   :  { %3092 = vtanh.f32 %v431_v55  ;;  %v2607_v57 = vmul.f32 -1.442695, %v431_v55 }
 0x63d   :  { %3094 = vpow2.f32 %v2607_v57 }
 0x648   :  { %v3093_v56 = vpop.eup %3092 }
 0x649   :  { %444 = vrot.lane.b32.xlu0 %v3093_v56, %s3206_s28 }
 0x64a   :  { %v3095_v58 = vpop.eup %3094 }
 0x64b   :  { %v435_v59 = vadd.f32 1.0, %v3095_v58 }
 0x64d   :  { %3096 = vrcp.f32 %v435_v59 }
 0x65a   :  { %v3097_v60 = vpop.eup %3096 }
 0x65b   :  { %v442_v1 = vmul.f32 %v3097_v60, %v440_v63 }
 0x6bb   :  { %v445_v61 = vpop.permute.xlu0 %444 }
 0x6bc   :  { %v447_v62 = vmul.f32 %v3097_v60, %v445_v61 }
 0x6be   :  { %449 = vrot.lane.b32.xlu1 %v447_v62, %s3207_s3 }
 0x730   :  { %v450_v3 = vpop.permute.xlu1 %449 }
 0x731   :  { %v452_v5 = vadd.f32 %v450_v3, %v442_v1 }
 0x733   :  { %3098 = vtanh.f32 %v452_v5  ;;  %v548_v28 = vrot.slane %v452_v5, 6 }
 0x740   :  { %v3099_v6 = vpop.eup %3098 }
 0x741   :  { %455 = vrot.lane.b32.xlu0 %v3099_v6, %s3206_s28 }
 0x7b3   :  { %v456_v12 = vpop.permute.xlu0 %455 }
 0x7b4   :  { %v458_v13 = vmul.f32 %v3097_v60, %v456_v12 }
 0x7b6   :  { %v460_v14 = vrot.slane %v458_v13, 4 }
 0x7b8   :  { %461 = vrot.lane.b32.xlu1 %v460_v14, %s3207_s3 }
 0x82a   :  { %v462_v15 = vpop.permute.xlu1 %461 }
 0x82b   :  { %2829 = vmatmul.mubr.msk.f32.vlgmr.msra.gmra.mxu0 %vm138_vm2, %v462_v15 }
 0x82c   :  { %2843 = vmatpush3.msra.mxu0 %v3295_v2  ;;  %2850 = vmatprep.mubr.msk.f32.mxu0 %vm3205_vm0, %v3204_v0 }
 0x82d   :  { %2844 = vmatprep.subr.mxu0 %v3204_v0 }
 0x82e   :  { %2845 = vmatpush3.msra.mxu0 %v3306_v4 }
 0x82f   :  { %2846 = vmatprep.subr.mxu0 %v3204_v0 }
 0x830   :  { %2847 = vmatpush3.msra.mxu0 %v3319_v7 }
 0x831   :  { %2848 = vmatprep.subr.mxu0 %v3204_v0 }
 0x832   :  { %2849 = vmatpush3.msra.mxu0 %v3325_v8 }
 0x833   :  { %2864 = vmatprep.subr.mxu0 %v3204_v0 }
 0x8eb   :  { %v531_v16 = vpop.f32.mrf.mxu0 }
 0x8ec   :  { %v536_v17 = vrot.slane %v531_v16, 2 }
 0x8ed   :  { %v2830_v18 = vpop.f32.mrf.mxu0 }
 0x8ee   :  { %v538_v19 = vadd.f32 %v536_v17, %v3355_v10 }
 0x8f0   :  { %v539_v20 = vadd.f32 %v3360_v11, %v538_v19 }
 0x8f2   :  { %3100 = vtanh.f32 %v539_v20  ;;  %v2609_v22 = vmul.f32 -1.442695, %v539_v20 }
 0x8f4   :  { %3102 = vpow2.f32 %v2609_v22 }
 0x8ff   :  { %v3101_v21 = vpop.eup %3100 }
 0x900   :  { %552 = vrot.lane.b32.xlu0 %v3101_v21, %s3206_s28 }
 0x901   :  { %v3103_v23 = vpop.eup %3102 }
 0x902   :  { %v543_v24 = vadd.f32 1.0, %v3103_v23 }
 0x904   :  { %3104 = vrcp.f32 %v543_v24 }
 0x911   :  { %v3105_v25 = vpop.eup %3104 }
 0x912   :  { %v550_v29 = vmul.f32 %v3105_v25, %v548_v28 }
 0x972   :  { %v553_v26 = vpop.permute.xlu0 %552 }
 0x973   :  { %v555_v27 = vmul.f32 %v3105_v25, %v553_v26 }
 0x975   :  { %557 = vrot.lane.b32.xlu1 %v555_v27, %s3207_s3 }
 0x9e7   :  { %v558_v30 = vpop.permute.xlu1 %557 }
 0x9e8   :  { %v560_v10 = vadd.f32 %v558_v30, %v550_v29 }
 0x9ea   :  { %3106 = vtanh.f32 %v560_v10  ;;  %v653_v47 = vrot.slane %v560_v10, 6 }
 0x9f7   :  { %v3107_v31 = vpop.eup %3106 }
 0x9f8   :  { %563 = vrot.lane.b32.xlu0 %v3107_v31, %s3206_s28 }
 0xa6a   :  { %v564_v32 = vpop.permute.xlu0 %563 }
 0xa6b   :  { %v566_v33 = vmul.f32 %v3105_v25, %v564_v32 }
 0xa6d   :  { %v568_v34 = vrot.slane %v566_v33, 6 }
 0xa6f   :  { %569 = vrot.lane.b32.xlu1 %v568_v34, %s3207_s3 }
 0xae1   :  { %v570_v35 = vpop.permute.xlu1 %569 }
 0xae2   :  { %2840 = vmatmul.mubr.msk.f32.vlgmr.msra.gmra.mxu1 %vm138_vm2, %v570_v35 }
 0xae3   :  { %2854 = vmatpush3.msra.mxu1 %v3295_v2  ;;  %2861 = vmatprep.mubr.msk.f32.mxu1 %vm3205_vm0, %v3204_v0 }
 0xae4   :  { %2855 = vmatprep.subr.mxu1 %v3204_v0 }
 0xae5   :  { %2856 = vmatpush3.msra.mxu1 %v3306_v4 }
 0xae6   :  { %2857 = vmatprep.subr.mxu1 %v3204_v0 }
 0xae7   :  { %2858 = vmatpush3.msra.mxu1 %v3319_v7 }
 0xae8   :  { %2859 = vmatprep.subr.mxu1 %v3204_v0 }
 0xae9   :  { %2860 = vmatpush3.msra.mxu1 %v3325_v8 }
 0xaea   :  { %2875 = vmatprep.subr.mxu1 %v3204_v0 }
 0xba2   :  { %v639_v36 = vpop.f32.mrf.mxu1 }
 0xba3   :  { %v643_v37 = vadd.f32 %v3353_v9, %v639_v36 }
 0xba4   :  { %v2841_v38 = vpop.f32.mrf.mxu1 }
 0xba5   :  { %v644_v39 = vadd.f32 %v3360_v11, %v643_v37 }
 0xba7   :  { %3108 = vtanh.f32 %v644_v39  ;;  %v2611_v41 = vmul.f32 -1.442695, %v644_v39 }
 0xba9   :  { %3110 = vpow2.f32 %v2611_v41 }
 0xbb4   :  { %v3109_v40 = vpop.eup %3108 }
 0xbb5   :  { %657 = vrot.lane.b32.xlu0 %v3109_v40, %s3206_s28 }
 0xbb6   :  { %v3111_v42 = vpop.eup %3110 }
 0xbb7   :  { %v648_v43 = vadd.f32 1.0, %v3111_v42 }
 0xbb9   :  { %3112 = vrcp.f32 %v648_v43 }
 0xbc6   :  { %v3113_v44 = vpop.eup %3112 }
 0xbc7   :  { %v655_v48 = vmul.f32 %v3113_v44, %v653_v47 }
 0xc27   :  { %v658_v45 = vpop.permute.xlu0 %657 }
 0xc28   :  { %v660_v46 = vmul.f32 %v3113_v44, %v658_v45 }
 0xc2a   :  { %662 = vrot.lane.b32.xlu1 %v660_v46, %s3207_s3 }
 0xc9c   :  { %v663_v49 = vpop.permute.xlu1 %662 }
 0xc9d   :  { %v665_v50 = vadd.f32 %v663_v49, %v655_v48 }
 0xc9f   :  { %3114 = vtanh.f32 %v665_v50  ;;  %v760_v63 = vrot.slane %v665_v50, 6 }
 0xcac   :  { %v3115_v51 = vpop.eup %3114 }
 0xcad   :  { %668 = vrot.lane.b32.xlu0 %v3115_v51, %s3206_s28  ;;  %v997_v51 = vld [vmem:[%s3829_s4 + $0x10] sm:$0xff] }
 0xd1f   :  { %v669_v52 = vpop.permute.xlu0 %668 }
 0xd20   :  { %v671_v53 = vmul.f32 %v3113_v44, %v669_v52  ;;  %v996_v52 = vld [vmem:[%s3829_s4 + $0x8] sm:$0xff] }
 0xd22   :  { %673 = vrot.lane.b32.xlu1 %v671_v53, %s3207_s3  ;;  %v995_v53 = vld [vmem:[%s3829_s4] sm:$0xff] }
 0xd94   :  { %v674_v54 = vpop.permute.xlu1 %673 }
 0xd95   :  { %2851 = vmatmul.mubr.msk.f32.vlgmr.msra.gmra.mxu0 %vm138_vm2, %v674_v54 }
 0xd96   :  { %2865 = vmatpush3.msra.mxu0 %v3295_v2  ;;  %2872 = vmatprep.mubr.msk.f32.mxu0 %vm3205_vm0, %v3204_v0 }
 0xd97   :  { %2866 = vmatprep.subr.mxu0 %v3204_v0 }
 0xd98   :  { %2867 = vmatpush3.msra.mxu0 %v3306_v4 }
 0xd99   :  { %2868 = vmatprep.subr.mxu0 %v3204_v0 }
 0xd9a   :  { %2869 = vmatpush3.msra.mxu0 %v3319_v7 }
 0xd9b   :  { %2870 = vmatprep.subr.mxu0 %v3204_v0 }
 0xd9c   :  { %2871 = vmatpush3.msra.mxu0 %v3325_v8 }
 0xd9d   :  { %2886 = vmatprep.subr.mxu0 %v3204_v0 }
 0xe55   :  { %v743_v55 = vpop.f32.mrf.mxu0 }
 0xe56   :  { %v748_v56 = vrot.slane %v743_v55, 6  ;;  %v1097_v55 = vld [vmem:[%s3830_s6] sm:$0xff] }
 0xe57   :  { %v2852_v2 = vpop.f32.mrf.mxu0 }
 0xe58   :  { %v750_v57 = vadd.f32 %v3353_v9, %v748_v56 }
 0xe5a   :  { %v751_v58 = vadd.f32 %v3360_v11, %v750_v57 }
 0xe5c   :  { %3116 = vtanh.f32 %v751_v58  ;;  %v2613_v4 = vmul.f32 -1.442695, %v751_v58 }
 0xe5e   :  { %3118 = vpow2.f32 %v2613_v4 }
 0xe69   :  { %v3117_v59 = vpop.eup %3116 }
 0xe6a   :  { %764 = vrot.lane.b32.xlu0 %v3117_v59, %s3206_s28  ;;  %v2618_v59 = vld [vmem:[%s3831_s5] ss:$0 sm:$0xff] }
 0xe6b   :  { %v3119_v7 = vpop.eup %3118 }
 0xe6c   :  { %v755_v60 = vadd.f32 1.0, %v3119_v7 }
 0xe6e   :  { %3120 = vrcp.f32 %v755_v60  ;;  %v1085_v60 = vld [vmem:[%s3832_s8 + $0x18] sm:$0xff] }
 0xe7b   :  { %v3121_v61 = vpop.eup %3120 }
 0xe7c   :  { %v762_v1 = vmul.f32 %v3121_v61, %v760_v63  ;;  %v1082_v63 = vld [vmem:[%s3832_s8] sm:$0xff] }
 0xedc   :  { %v765_v8 = vpop.permute.xlu0 %764 }
 0xedd   :  { %v767_v62 = vmul.f32 %v3121_v61, %v765_v8  ;;  %v1084_v8 = vld [vmem:[%s3832_s8 + $0x10] sm:$0xff] }
 0xedf   :  { %769 = vrot.lane.b32.xlu1 %v767_v62, %s3207_s3  ;;  %v1083_v62 = vld [vmem:[%s3832_s8 + $0x8] sm:$0xff] }
 0xf51   :  { %v770_v3 = vpop.permute.xlu1 %769 }
 0xf52   :  { %v772_v5 = vadd.f32 %v770_v3, %v762_v1  ;;  %v2620_v1 = vld [vmem:[%s3833_s7] ss:$0 sm:$0xff] }
 0xf54   :  { %3122 = vtanh.f32 %v772_v5  ;;  %v868_v28 = vrot.slane %v772_v5, 6 }
 0xf61   :  { %v3123_v6 = vpop.eup %3122 }
 0xf62   :  { %775 = vrot.lane.b32.xlu0 %v3123_v6, %s3206_s28 }
 0xfd4   :  { %v776_v12 = vpop.permute.xlu0 %775 }
 0xfd5   :  { %v778_v13 = vmul.f32 %v3121_v61, %v776_v12  ;;  %v2622_v12 = vld [vmem:[%s3834_s9] ss:$0 sm:$0xff] }
 0xfd7   :  { %v780_v14 = vrot.slane %v778_v13, 2 }
 0xfd9   :  { %781 = vrot.lane.b32.xlu1 %v780_v14, %s3207_s3 }
0x104b   :  { %v782_v15 = vpop.permute.xlu1 %781 }
0x104c   :  { %2862 = vmatmul.mubr.msk.f32.vlgmr.msra.gmra.mxu1 %vm138_vm2, %v782_v15 }
0x104d   :  { %2883 = vmatprep.mubr.msk.f32.mxu1 %vm3205_vm0, %v3204_v0 }
0x110c   :  { %v851_v16 = vpop.f32.mrf.mxu1 }
0x110d   :  { %v856_v17 = vrot.slane %v851_v16, 4 }
0x110e   :  { %v2863_v18 = vpop.f32.mrf.mxu1 }
0x110f   :  { %v858_v19 = vadd.f32 %v3353_v9, %v856_v17 }
0x1111   :  { %v859_v20 = vadd.f32 %v3360_v11, %v858_v19 }
0x1113   :  { %3124 = vtanh.f32 %v859_v20  ;;  %v2615_v22 = vmul.f32 -1.442695, %v859_v20 }
0x1115   :  { %3126 = vpow2.f32 %v2615_v22 }
0x1120   :  { %v3125_v21 = vpop.eup %3124 }
0x1121   :  { %872 = vrot.lane.b32.xlu0 %v3125_v21, %s3206_s28 }
0x1122   :  { %v3127_v23 = vpop.eup %3126 }
0x1123   :  { %v863_v24 = vadd.f32 1.0, %v3127_v23 }
0x1125   :  { %3128 = vrcp.f32 %v863_v24 }
0x1132   :  { %v3129_v25 = vpop.eup %3128 }
0x1133   :  { %v870_v29 = vmul.f32 %v3129_v25, %v868_v28  ;;  %v3542_v28 = vld [vmem:[%s3835_s12 + $0x10] sm:$0xff] }
0x1193   :  { %v873_v26 = vpop.permute.xlu0 %872 }
0x1194   :  { %v875_v27 = vmul.f32 %v3129_v25, %v873_v26  ;;  %v3532_v26 = vld [vmem:[%s3835_s12 + $0x18] sm:$0xff] }
0x1196   :  { %877 = vrot.lane.b32.xlu1 %v875_v27, %s3207_s3  ;;  %v3537_v27 = vld [vmem:[%s3836_s10 + $0x18] sm:$0xff] }
0x1208   :  { %v878_v30 = vpop.permute.xlu1 %877 }
0x1209   :  { %v880_v10 = vadd.f32 %v878_v30, %v870_v29  ;;  %v3549_v29 = vld [vmem:[%s3836_s10 + $0x10] sm:$0xff]  ;;  %v3556_v30 = vld [vmem:[%s3835_s12 + $0x8] sm:$0xff] }
0x120b   :  { %3130 = vtanh.f32 %v880_v10  ;;  %v976_v48 = vrot.slane %v880_v10, 6  ;;  %v3561_v10 = vld [vmem:[%s3836_s10 + $0x8] sm:$0xff] }
0x1218   :  { %v3131_v31 = vpop.eup %3130 }
0x1219   :  { %883 = vrot.lane.b32.xlu0 %v3131_v31, %s3206_s28  ;;  %v3570_v31 = vld [vmem:[%s3835_s12] sm:$0xff] }
0x128b   :  { %v884_v32 = vpop.permute.xlu0 %883 }
0x128c   :  { %v886_v33 = vmul.f32 %v3129_v25, %v884_v32  ;;  %v3575_v32 = vld [vmem:[%s3836_s10] sm:$0xff] }
0x128e   :  { %v888_v34 = vrot.slane %v886_v33, 4 }
0x1290   :  { %889 = vrot.lane.b32.xlu1 %v888_v34, %s3207_s3 }
0x1302   :  { %v890_v35 = vpop.permute.xlu1 %889 }
0x1303   :  { %2873 = vmatmul.mubr.msk.f32.vlgmr.msra.gmra.mxu0 %vm138_vm2, %v890_v35 }
0x1304   :  { %2888 = vmatprep.mubr.msk.f32.mxu0 %vm3205_vm0, %v3204_v0  ;;  %2887 = vmatpush3.msra.mxu0 %v1097_v55 }
0x1305   :  { %2891 = vmatprep.subr.mxu0 %v3204_v0 }
0x13c3   :  { %v959_v36 = vpop.f32.mrf.mxu0 }
0x13c4   :  { %v964_v37 = vrot.slane %v959_v36, 2 }
0x13c5   :  { %v2874_v38 = vpop.f32.mrf.mxu0 }
0x13c6   :  { %v966_v39 = vadd.f32 %v3353_v9, %v964_v37  ;;  %v3612_v37 = vld [vmem:[%s3837_s13] ss:$0 sm:$0xff]  ;;  %s3209_s13 = smov 48  }
0x13c7   :  { %v3617_v38 = vld [vmem:[%s3838_s11] ss:$0 sm:$0xff]  ;;  %s3208_s11 = smov 16  }
0x13c8   :  { %v967_v40 = vadd.f32 %v3360_v11, %v966_v39  ;;  %v998_v11 = vld [vmem:[%s3829_s4 + $0x18] sm:$0xff] }
0x13c9   :  { %2876 = vmatpush3.msra.mxu1 %v998_v11 }
0x13ca   :  { %3132 = vtanh.f32 %v967_v40  ;;  %v2617_v42 = vmul.f32 -1.442695, %v967_v40  ;;  %2877 = vmatprep.subr.mxu1 %v3204_v0 }
0x13cb   :  { %2878 = vmatpush3.msra.mxu1 %v997_v51 }
0x13cc   :  { %3134 = vpow2.f32 %v2617_v42  ;;  %2879 = vmatprep.subr.mxu1 %v3204_v0 }
0x13cd   :  { %2880 = vmatpush3.msra.mxu1 %v996_v52 }
0x13ce   :  { %2881 = vmatprep.subr.mxu1 %v3204_v0 }
0x13cf   :  { %2882 = vmatpush3.msra.mxu1 %v995_v53 }
0x13d0   :  { %2902 = vmatprep.subr.mxu1 %v3204_v0 }
0x13d7   :  { %v3133_v41 = vpop.eup %3132 }
0x13d8   :  { %980 = vrot.lane.b32.xlu0 %v3133_v41, %s3206_s28 }
0x13d9   :  { %v3135_v43 = vpop.eup %3134 }
0x13da   :  { %v971_v44 = vadd.f32 1.0, %v3135_v43 }
0x13dc   :  { %3136 = vrcp.f32 %v971_v44 }
0x13e9   :  { %v3137_v45 = vpop.eup %3136 }
0x13ea   :  { %v978_v49 = vmul.f32 %v3137_v45, %v976_v48 }
0x144a   :  { %v981_v46 = vpop.permute.xlu0 %980 }
0x144b   :  { %v983_v47 = vmul.f32 %v3137_v45, %v981_v46 }
0x144d   :  { %985 = vrot.lane.b32.xlu1 %v983_v47, %s3207_s3 }
0x14bf   :  { %v986_v50 = vpop.permute.xlu1 %985 }
0x14c0   :  { %v988_v9 = vadd.f32 %v986_v50, %v978_v49 }
0x14c2   :  { %3138 = vtanh.f32 %v988_v9 }
0x14cf   :  { %v3139_v54 = vpop.eup %3138 }
0x14d0   :  { %991 = vrot.lane.b32.xlu0 %v3139_v54, %s3206_s28 }
0x1542   :  { %v992_v56 = vpop.permute.xlu0 %991 }
0x1543   :  { %v994_v2 = vmul.f32 %v3137_v45, %v992_v56 }
0x1545   :  { %v1007_v57 = vrot.slane %v994_v2, 6 }
0x1547   :  { %1008 = vrot.lane.b32.xlu1 %v1007_v57, %s3207_s3 }
0x15b9   :  { %v1009_v58 = vpop.permute.xlu1 %1008 }
0x15ba   :  { %2884 = vmatmul.mubr.msk.f32.vlgmr.msra.gmra.mxu1 %vm138_vm2, %v1009_v58 }
0x15bb   :  { %2910 = vmatprep.mubr.msk.f32.mxu1 %vm3205_vm0, %v3204_v0  ;;  %2903 = vmatpush3.msra.mxu1 %v3532_v26 }
0x15bc   :  { %2904 = vmatprep.subr.mxu1 %v3204_v0 }
0x15bd   :  { %2905 = vmatpush3.msra.mxu1 %v3542_v28 }
0x15be   :  { %2906 = vmatprep.subr.mxu1 %v3204_v0 }
0x15bf   :  { %2907 = vmatpush3.msra.mxu1 %v3556_v30 }
0x15c0   :  { %2908 = vmatprep.subr.mxu1 %v3204_v0 }
0x15c1   :  { %2909 = vmatpush3.msra.mxu1 %v3570_v31 }
0x15c2   :  { %2924 = vmatprep.subr.mxu1 %v3204_v0 }
0x167a   :  { %v1078_v4 = vpop.f32.mrf.mxu1 }
0x167b   :  { %v1079_v7 = vadd.f32 %v2618_v59, %v1078_v4 }
0x167c   :  { %v2885_v61 = vpop.f32.mrf.mxu1 }
0x167d   :  { %2889 = vmatmul.mubr.msk.f32.vlgmr.msra.gmra.mxu0 %vm1105_vm3, %v1079_v7 }
0x167e   :  { %2892 = vmatpush3.msra.mxu0 %v1085_v60  ;;  %2899 = vmatprep.mubr.msk.f32.mxu0 %vm3205_vm0, %v3204_v0 }
0x167f   :  { %2893 = vmatprep.subr.mxu0 %v3204_v0 }
0x1680   :  { %2894 = vmatpush3.msra.mxu0 %v1084_v8 }
0x1681   :  { %2895 = vmatprep.subr.mxu0 %v3204_v0 }
0x1682   :  { %2896 = vmatpush3.msra.mxu0 %v1083_v62 }
0x1683   :  { %2897 = vmatprep.subr.mxu0 %v3204_v0 }
0x1684   :  { %2898 = vmatpush3.msra.mxu0 %v1082_v63 }
0x1685   :  { %2913 = vmatprep.subr.mxu0 %v3204_v0 }
0x173d   :  { %v1175_v3 = vpop.f32.mrf.mxu0 }
0x173e   :  { %v1176_v5 = vadd.f32 %v2620_v1, %v1175_v3 }
0x173f   :  { %v2890_v6 = vpop.f32.mrf.mxu0 }
0x1740   :  { %2900 = vmatmul.mubr.msk.f32.vlgmr.msra.gmra.mxu0 %vm138_vm2, %v1176_v5 }
0x1741   :  { %2921 = vmatprep.mubr.msk.f32.mxu0 %vm3205_vm0, %v3204_v0  ;;  %2914 = vmatpush3.msra.mxu0 %v3537_v27 }
0x1742   :  { %2915 = vmatprep.subr.mxu0 %v3204_v0 }
0x1743   :  { %2916 = vmatpush3.msra.mxu0 %v3549_v29 }
0x1744   :  { %2917 = vmatprep.subr.mxu0 %v3204_v0 }
0x1745   :  { %2918 = vmatpush3.msra.mxu0 %v3561_v10 }
0x1746   :  { %2919 = vmatprep.subr.mxu0 %v3204_v0 }
0x1747   :  { %2920 = vmatpush3.msra.mxu0 %v3575_v32 }
0x1748   :  { %2935 = vmatprep.subr.mxu0 %v3204_v0 }
0x1800   :  { %v1254_v13 = vpop.f32.mrf.mxu0 }
0x1801   :  { %v1255_v14 = vadd.f32 %v2622_v12, %v1254_v13 }
0x1802   :  { %v2901_v15 = vpop.f32.mrf.mxu0 }
0x1803   :  { %3140 = vtanh.f32 %v1255_v14  ;;  %v2624_v17 = vmul.f32 -1.442695, %v1255_v14 }
0x1805   :  { %3142 = vpow2.f32 %v2624_v17 }
0x1810   :  { %v3141_v16 = vpop.eup %3140 }
0x1811   :  { %1267 = vrot.lane.b32.xlu0 %v3141_v16, %s3206_s28 }
0x1812   :  { %v3143_v18 = vpop.eup %3142 }
0x1813   :  { %v1261_v19 = vadd.f32 1.0, %v3143_v18 }
0x1815   :  { %3144 = vrcp.f32 %v1261_v19 }
0x1822   :  { %v3145_v20 = vpop.eup %3144 }
0x1823   :  { %v1265_v23 = vmul.f32 0.0, %v3145_v20 }
0x1883   :  { %v1268_v21 = vpop.permute.xlu0 %1267 }
0x1884   :  { %v1270_v22 = vmul.f32 %v3145_v20, %v1268_v21 }
0x1886   :  { %1272 = vrot.lane.b32.xlu1 %v1270_v22, %s3207_s3 }
0x18f8   :  { %v1273_v24 = vpop.permute.xlu1 %1272 }
0x18f9   :  { %v3526_v25 = vadd.f32 %v1273_v24, %v1265_v23 }
0x18fb   :  { %3146 = vtanh.f32 %v3526_v25 }
0x1908   :  { %v3147_v33 = vpop.eup %3146 }
0x1909   :  { %1278 = vrot.lane.b32.xlu0 %v3147_v33, %s3206_s28 }
0x197b   :  { %v1279_v34 = vpop.permute.xlu0 %1278 }
0x197c   :  { %v1281_v35 = vmul.f32 %v3145_v20, %v1279_v34 }
0x197e   :  { %1289 = vrot.lane.b32.xlu1 %v1281_v35, %s3207_s3 }
0x19f0   :  { %v1290_v36 = vpop.permute.xlu1 %1289 }
0x19f1   :  { %2911 = vmatmul.mubr.msk.f32.vlgmr.msra.gmra.mxu1 %vm138_vm2, %v1290_v36  ;;  %2922 = vmatmul.mubr.msk.f32.vlgmr.msra.gmra.mxu0 %vm138_vm2, %v1290_v36 }
0x19f2   :  { %2925 = vmatpush3.msra.mxu1 %v3532_v26  ;;  %2936 = vmatpush3.msra.mxu0 %v3537_v27 }
0x19f3   :  { %2926 = vmatprep.subr.mxu1 %v3204_v0  ;;  %2937 = vmatprep.subr.mxu0 %v3204_v0 }
0x19f4   :  { %2927 = vmatpush3.msra.mxu1 %v3542_v28  ;;  %2938 = vmatpush3.msra.mxu0 %v3549_v29 }
0x19f5   :  { %2928 = vmatprep.subr.mxu1 %v3204_v0  ;;  %2939 = vmatprep.subr.mxu0 %v3204_v0 }
0x19f6   :  { %2929 = vmatpush3.msra.mxu1 %v3556_v30  ;;  %2940 = vmatpush3.msra.mxu0 %v3561_v10 }
0x19f7   :  { %2930 = vmatprep.subr.mxu1 %v3204_v0  ;;  %2941 = vmatprep.subr.mxu0 %v3204_v0 }
0x19f8   :  { %2931 = vmatpush3.msra.mxu1 %v3570_v31  ;;  %2932 = vmatprep.mubr.msk.f32.mxu1 %vm3205_vm0, %v3204_v0 }
0x19f9   :  { %2942 = vmatpush3.msra.mxu0 %v3575_v32  ;;  %2943 = vmatprep.mubr.msk.f32.mxu0 %vm3205_vm0, %v3204_v0 }
0x19fa   :  { %2946 = vmatprep.subr.mxu1 %v3204_v0  ;;  %2957 = vmatprep.subr.mxu0 %v3204_v0 }
0x1ab1   :  { %v1359_v39 = vpop.f32.mrf.mxu1  ;;  %v1437_v40 = vpop.f32.mrf.mxu0 }
0x1ab2   :  { %v1360_v41 = vadd.f32 %v3612_v37, %v1359_v39  ;;  %v1438_v42 = vadd.f32 %v3617_v38, %v1437_v40 }
0x1ab3   :  { %v2912_v43 = vpop.f32.mrf.mxu1  ;;  %v2923_v44 = vpop.f32.mrf.mxu0 }
0x1ab4   :  { %1364 = vst.msk [vmem:[%s3839_s14] sm:$0x3] %vm1363_vm4, %v1360_v41  ;;  %3148 = vtanh.f32 %v1438_v42  ;;  %v2629_v46 = vmul.f32 -1.442695, %v1438_v42 }
0x1ab6   :  { %3150 = vpow2.f32 %v2629_v46 }
0x1ac1   :  { %v3149_v45 = vpop.eup %3148 }
0x1ac2   :  { %1450 = vrot.lane.b32.xlu0 %v3149_v45, %s3206_s28 }
0x1ac3   :  { %v3151_v47 = vpop.eup %3150 }
0x1ac4   :  { %v1444_v48 = vadd.f32 1.0, %v3151_v47 }
0x1ac6   :  { %3152 = vrcp.f32 %v1444_v48 }
0x1ad3   :  { %v3153_v49 = vpop.eup %3152 }
0x1ad4   :  { %v1448_v11 = vmul.f32 %v3153_v49, %v3526_v25 }
0x1b34   :  { %v1451_v50 = vpop.permute.xlu0 %1450 }
0x1b35   :  { %v1453_v9 = vmul.f32 %v3153_v49, %v1451_v50 }
0x1b37   :  { %1455 = vrot.lane.b32.xlu1 %v1453_v9, %s3207_s3 }
0x1ba9   :  { %v1456_v51 = vpop.permute.xlu1 %1455 }
0x1baa   :  { %v1458_v52 = vadd.f32 %v1456_v51, %v1448_v11 }
0x1bac   :  { %3154 = vtanh.f32 %v1458_v52 }
0x1bb9   :  { %v3155_v53 = vpop.eup %3154 }
0x1bba   :  { %1461 = vrot.lane.b32.xlu0 %v3155_v53, %s3206_s28 }
0x1c2c   :  { %v1462_v54 = vpop.permute.xlu0 %1461 }
0x1c2d   :  { %v1464_v55 = vmul.f32 %v3153_v49, %v1462_v54 }
0x1c2f   :  { %1466 = vrot.lane.b32.xlu1 %v1464_v55, %s3207_s3 }
0x1ca1   :  { %v1467_v56 = vpop.permute.xlu1 %1466 }
0x1ca2   :  { %2933 = vmatmul.mubr.msk.f32.vlgmr.msra.gmra.mxu1 %vm138_vm2, %v1467_v56  ;;  %2944 = vmatmul.mubr.msk.f32.vlgmr.msra.gmra.mxu0 %vm138_vm2, %v1467_v56 }
0x1ca3   :  { %2947 = vmatpush3.msra.mxu1 %v3532_v26  ;;  %2958 = vmatpush3.msra.mxu0 %v3537_v27 }
0x1ca4   :  { %2948 = vmatprep.subr.mxu1 %v3204_v0  ;;  %2959 = vmatprep.subr.mxu0 %v3204_v0 }
0x1ca5   :  { %2949 = vmatpush3.msra.mxu1 %v3542_v28  ;;  %2960 = vmatpush3.msra.mxu0 %v3549_v29 }
0x1ca6   :  { %2950 = vmatprep.subr.mxu1 %v3204_v0  ;;  %2961 = vmatprep.subr.mxu0 %v3204_v0 }
0x1ca7   :  { %2951 = vmatpush3.msra.mxu1 %v3556_v30  ;;  %2962 = vmatpush3.msra.mxu0 %v3561_v10 }
0x1ca8   :  { %2952 = vmatprep.subr.mxu1 %v3204_v0  ;;  %2963 = vmatprep.subr.mxu0 %v3204_v0 }
0x1ca9   :  { %2953 = vmatpush3.msra.mxu1 %v3570_v31  ;;  %2954 = vmatprep.mubr.msk.f32.mxu1 %vm3205_vm0, %v3204_v0 }
0x1caa   :  { %2964 = vmatpush3.msra.mxu0 %v3575_v32  ;;  %2965 = vmatprep.mubr.msk.f32.mxu0 %vm3205_vm0, %v3204_v0 }
0x1cab   :  { %2968 = vmatprep.subr.mxu1 %v3204_v0  ;;  %2979 = vmatprep.subr.mxu0 %v3204_v0 }
0x1d62   :  { %v3651_v2 = vpop.f32.mrf.mxu1  ;;  %v1612_v57 = vpop.f32.mrf.mxu0 }
0x1d63   :  { %v1613_v58 = vadd.f32 %v3617_v38, %v1612_v57 }
0x1d64   :  { %v2934_v59 = vpop.f32.mrf.mxu1  ;;  %v2945_v4 = vpop.f32.mrf.mxu0 }
0x1d65   :  { %3156 = vtanh.f32 %v1613_v58  ;;  %v2632_v60 = vmul.f32 -1.442695, %v1613_v58 }
0x1d67   :  { %3158 = vpow2.f32 %v2632_v60 }
0x1d72   :  { %v3157_v7 = vpop.eup %3156 }
0x1d73   :  { %1625 = vrot.lane.b32.xlu0 %v3157_v7, %s3206_s28 }
0x1d74   :  { %v3159_v61 = vpop.eup %3158 }
0x1d75   :  { %v1619_v8 = vadd.f32 1.0, %v3159_v61 }
0x1d77   :  { %3160 = vrcp.f32 %v1619_v8 }
0x1d84   :  { %v3161_v62 = vpop.eup %3160 }
0x1d85   :  { %v1623_v3 = vmul.f32 %v3161_v62, %v1458_v52 }
0x1de5   :  { %v1626_v63 = vpop.permute.xlu0 %1625 }
0x1de6   :  { %v1628_v1 = vmul.f32 %v3161_v62, %v1626_v63 }
0x1de8   :  { %1630 = vrot.lane.b32.xlu1 %v1628_v1, %s3207_s3 }
0x1e5a   :  { %v1631_v5 = vpop.permute.xlu1 %1630 }
0x1e5b   :  { %v1633_v6 = vadd.f32 %v1631_v5, %v1623_v3 }
0x1e5d   :  { %3162 = vtanh.f32 %v1633_v6 }
0x1e6a   :  { %v3163_v12 = vpop.eup %3162 }
0x1e6b   :  { %1636 = vrot.lane.b32.xlu0 %v3163_v12, %s3206_s28 }
0x1edd   :  { %v1637_v13 = vpop.permute.xlu0 %1636 }
0x1ede   :  { %v1639_v14 = vmul.f32 %v3161_v62, %v1637_v13 }
0x1ee0   :  { %1641 = vrot.lane.b32.xlu1 %v1639_v14, %s3207_s3 }
0x1f52   :  { %v1642_v15 = vpop.permute.xlu1 %1641 }
0x1f53   :  { %2955 = vmatmul.mubr.msk.f32.vlgmr.msra.gmra.mxu1 %vm138_vm2, %v1642_v15  ;;  %2966 = vmatmul.mubr.msk.f32.vlgmr.msra.gmra.mxu0 %vm138_vm2, %v1642_v15 }
0x1f54   :  { %2969 = vmatpush3.msra.mxu1 %v3532_v26  ;;  %2980 = vmatpush3.msra.mxu0 %v3537_v27 }
0x1f55   :  { %2970 = vmatprep.subr.mxu1 %v3204_v0  ;;  %2981 = vmatprep.subr.mxu0 %v3204_v0 }
0x1f56   :  { %2971 = vmatpush3.msra.mxu1 %v3542_v28  ;;  %2982 = vmatpush3.msra.mxu0 %v3549_v29 }
0x1f57   :  { %2972 = vmatprep.subr.mxu1 %v3204_v0  ;;  %2983 = vmatprep.subr.mxu0 %v3204_v0 }
0x1f58   :  { %2973 = vmatpush3.msra.mxu1 %v3556_v30  ;;  %2984 = vmatpush3.msra.mxu0 %v3561_v10 }
0x1f59   :  { %2974 = vmatprep.subr.mxu1 %v3204_v0  ;;  %2985 = vmatprep.subr.mxu0 %v3204_v0 }
0x1f5a   :  { %2975 = vmatpush3.msra.mxu1 %v3570_v31  ;;  %2976 = vmatprep.mubr.msk.f32.mxu1 %vm3205_vm0, %v3204_v0 }
0x1f5b   :  { %2986 = vmatpush3.msra.mxu0 %v3575_v32  ;;  %2987 = vmatprep.mubr.msk.f32.mxu0 %vm3205_vm0, %v3204_v0 }
0x1f5c   :  { %2990 = vmatprep.subr.mxu1 %v3204_v0  ;;  %3001 = vmatprep.subr.mxu0 %v3204_v0 }
0x2013   :  { %v3680_v16 = vpop.f32.mrf.mxu1  ;;  %v1787_v17 = vpop.f32.mrf.mxu0 }
0x2014   :  { %v1788_v18 = vadd.f32 %v3617_v38, %v1787_v17 }
0x2015   :  { %v2956_v19 = vpop.f32.mrf.mxu1  ;;  %v2967_v20 = vpop.f32.mrf.mxu0 }
0x2016   :  { %3164 = vtanh.f32 %v1788_v18  ;;  %v2635_v22 = vmul.f32 -1.442695, %v1788_v18 }
0x2018   :  { %3166 = vpow2.f32 %v2635_v22 }
0x2023   :  { %v3165_v21 = vpop.eup %3164 }
0x2024   :  { %1800 = vrot.lane.b32.xlu0 %v3165_v21, %s3206_s28 }
0x2025   :  { %v3167_v23 = vpop.eup %3166 }
0x2026   :  { %v1794_v24 = vadd.f32 1.0, %v3167_v23 }
0x2028   :  { %3168 = vrcp.f32 %v1794_v24 }
0x2035   :  { %v3169_v25 = vpop.eup %3168 }
0x2036   :  { %v1798_v35 = vmul.f32 %v3169_v25, %v1633_v6 }
0x2096   :  { %v1801_v33 = vpop.permute.xlu0 %1800 }
0x2097   :  { %v1803_v34 = vmul.f32 %v3169_v25, %v1801_v33 }
0x2099   :  { %1805 = vrot.lane.b32.xlu1 %v1803_v34, %s3207_s3 }
0x210b   :  { %v1806_v36 = vpop.permute.xlu1 %1805 }
0x210c   :  { %v1808_v39 = vadd.f32 %v1806_v36, %v1798_v35 }
0x210e   :  { %3170 = vtanh.f32 %v1808_v39 }
0x211b   :  { %v3171_v40 = vpop.eup %3170 }
0x211c   :  { %1811 = vrot.lane.b32.xlu0 %v3171_v40, %s3206_s28 }
0x218e   :  { %v1812_v41 = vpop.permute.xlu0 %1811 }
0x218f   :  { %v1814_v42 = vmul.f32 %v3169_v25, %v1812_v41 }
0x2191   :  { %1816 = vrot.lane.b32.xlu1 %v1814_v42, %s3207_s3 }
0x2203   :  { %v1817_v43 = vpop.permute.xlu1 %1816 }
0x2204   :  { %2977 = vmatmul.mubr.msk.f32.vlgmr.msra.gmra.mxu1 %vm138_vm2, %v1817_v43  ;;  %2988 = vmatmul.mubr.msk.f32.vlgmr.msra.gmra.mxu0 %vm138_vm2, %v1817_v43 }
0x2205   :  { %2991 = vmatpush3.msra.mxu1 %v3532_v26  ;;  %3002 = vmatpush3.msra.mxu0 %v3537_v27 }
0x2206   :  { %2992 = vmatprep.subr.mxu1 %v3204_v0  ;;  %3003 = vmatprep.subr.mxu0 %v3204_v0 }
0x2207   :  { %2993 = vmatpush3.msra.mxu1 %v3542_v28  ;;  %3004 = vmatpush3.msra.mxu0 %v3549_v29 }
0x2208   :  { %2994 = vmatprep.subr.mxu1 %v3204_v0  ;;  %3005 = vmatprep.subr.mxu0 %v3204_v0 }
0x2209   :  { %2995 = vmatpush3.msra.mxu1 %v3556_v30  ;;  %3006 = vmatpush3.msra.mxu0 %v3561_v10 }
0x220a   :  { %2996 = vmatprep.subr.mxu1 %v3204_v0  ;;  %3007 = vmatprep.subr.mxu0 %v3204_v0 }
0x220b   :  { %2997 = vmatpush3.msra.mxu1 %v3570_v31  ;;  %2998 = vmatprep.mubr.msk.f32.mxu1 %vm3205_vm0, %v3204_v0 }
0x220c   :  { %3008 = vmatpush3.msra.mxu0 %v3575_v32  ;;  %3009 = vmatprep.mubr.msk.f32.mxu0 %vm3205_vm0, %v3204_v0 }
0x220d   :  { %3012 = vmatprep.subr.mxu1 %v3204_v0  ;;  %3023 = vmatprep.subr.mxu0 %v3204_v0 }
0x22c4   :  { %v3709_v44 = vpop.f32.mrf.mxu1  ;;  %v1962_v45 = vpop.f32.mrf.mxu0 }
0x22c5   :  { %v1963_v46 = vadd.f32 %v3617_v38, %v1962_v45 }
0x22c6   :  { %v2978_v47 = vpop.f32.mrf.mxu1  ;;  %v2989_v48 = vpop.f32.mrf.mxu0 }
0x22c7   :  { %3172 = vtanh.f32 %v1963_v46  ;;  %v2638_v50 = vmul.f32 -1.442695, %v1963_v46 }
0x22c9   :  { %3174 = vpow2.f32 %v2638_v50 }
0x22d4   :  { %v3173_v49 = vpop.eup %3172 }
0x22d5   :  { %1975 = vrot.lane.b32.xlu0 %v3173_v49, %s3206_s28 }
0x22d6   :  { %v3175_v9 = vpop.eup %3174 }
0x22d7   :  { %v1969_v11 = vadd.f32 1.0, %v3175_v9 }
0x22d9   :  { %3176 = vrcp.f32 %v1969_v11 }
0x22e6   :  { %v3177_v51 = vpop.eup %3176 }
0x22e7   :  { %v1973_v54 = vmul.f32 %v3177_v51, %v1808_v39 }
0x2347   :  { %v1976_v52 = vpop.permute.xlu0 %1975 }
0x2348   :  { %v1978_v53 = vmul.f32 %v3177_v51, %v1976_v52 }
0x234a   :  { %1980 = vrot.lane.b32.xlu1 %v1978_v53, %s3207_s3 }
0x23bc   :  { %v1981_v55 = vpop.permute.xlu1 %1980 }
0x23bd   :  { %v1983_v56 = vadd.f32 %v1981_v55, %v1973_v54  ;;  %v1537_v55 = vadd.f32 %v3612_v37, %v3651_v2  ;;  %v1712_v2 = vadd.f32 %v3612_v37, %v3680_v16 }
0x23bf   :  { %3178 = vtanh.f32 %v1983_v56 }
0x23cc   :  { %v3179_v57 = vpop.eup %3178 }
0x23cd   :  { %1986 = vrot.lane.b32.xlu0 %v3179_v57, %s3206_s28 }
0x243f   :  { %v1987_v58 = vpop.permute.xlu0 %1986 }
0x2440   :  { %v1989_v59 = vmul.f32 %v3177_v51, %v1987_v58 }
0x2442   :  { %1991 = vrot.lane.b32.xlu1 %v1989_v59, %s3207_s3 }
0x24b4   :  { %v1992_v4 = vpop.permute.xlu1 %1991 }
0x24b5   :  { %2999 = vmatmul.mubr.msk.f32.vlgmr.msra.gmra.mxu1 %vm138_vm2, %v1992_v4  ;;  %3010 = vmatmul.mubr.msk.f32.vlgmr.msra.gmra.mxu0 %vm138_vm2, %v1992_v4 }
0x24b6   :  { %3013 = vmatpush3.msra.mxu1 %v3532_v26  ;;  %3024 = vmatpush3.msra.mxu0 %v3537_v27 }
0x24b7   :  { %3014 = vmatprep.subr.mxu1 %v3204_v0  ;;  %3025 = vmatprep.subr.mxu0 %v3204_v0 }
0x24b8   :  { %3015 = vmatpush3.msra.mxu1 %v3542_v28  ;;  %3026 = vmatpush3.msra.mxu0 %v3549_v29 }
0x24b9   :  { %3016 = vmatprep.subr.mxu1 %v3204_v0  ;;  %3027 = vmatprep.subr.mxu0 %v3204_v0 }
0x24ba   :  { %3017 = vmatpush3.msra.mxu1 %v3556_v30  ;;  %3028 = vmatpush3.msra.mxu0 %v3561_v10 }
0x24bb   :  { %3018 = vmatprep.subr.mxu1 %v3204_v0  ;;  %3029 = vmatprep.subr.mxu0 %v3204_v0 }
0x24bc   :  { %3019 = vmatpush3.msra.mxu1 %v3570_v31  ;;  %3020 = vmatprep.mubr.msk.f32.mxu1 %vm3205_vm0, %v3204_v0 }
0x24bd   :  { %3030 = vmatpush3.msra.mxu0 %v3575_v32  ;;  %3031 = vmatprep.mubr.msk.f32.mxu0 %vm3205_vm0, %v3204_v0 }
0x24be   :  { %3034 = vmatprep.subr.mxu1 %v3204_v0  ;;  %3045 = vmatprep.subr.mxu0 %v3204_v0 }
0x2575   :  { %v3738_v7 = vpop.f32.mrf.mxu1  ;;  %v2137_v60 = vpop.f32.mrf.mxu0 }
0x2576   :  { %v2138_v61 = vadd.f32 %v3617_v38, %v2137_v60 }
0x2577   :  { %v3000_v8 = vpop.f32.mrf.mxu1  ;;  %v3011_v62 = vpop.f32.mrf.mxu0 }
0x2578   :  { %3180 = vtanh.f32 %v2138_v61  ;;  %v2641_v1 = vmul.f32 -1.442695, %v2138_v61 }
0x257a   :  { %3182 = vpow2.f32 %v2641_v1 }
0x2585   :  { %v3181_v63 = vpop.eup %3180 }
0x2586   :  { %2150 = vrot.lane.b32.xlu0 %v3181_v63, %s3206_s28 }
0x2587   :  { %v3183_v3 = vpop.eup %3182 }
0x2588   :  { %v2144_v5 = vadd.f32 1.0, %v3183_v3 }
0x258a   :  { %3184 = vrcp.f32 %v2144_v5 }
0x2597   :  { %v3185_v6 = vpop.eup %3184 }
0x2598   :  { %v2148_v14 = vmul.f32 %v3185_v6, %v1983_v56  ;;  %v1887_v56 = vadd.f32 %v3612_v37, %v3709_v44  ;;  %v2062_v44 = vadd.f32 %v3612_v37, %v3738_v7 }
0x25f8   :  { %v2151_v12 = vpop.permute.xlu0 %2150 }
0x25f9   :  { %v2153_v13 = vmul.f32 %v3185_v6, %v2151_v12 }
0x25fb   :  { %2155 = vrot.lane.b32.xlu1 %v2153_v13, %s3207_s3 }
0x266d   :  { %v2156_v15 = vpop.permute.xlu1 %2155 }
0x266e   :  { %v2158_v17 = vadd.f32 %v2156_v15, %v2148_v14 }
0x2670   :  { %3186 = vtanh.f32 %v2158_v17 }
0x267d   :  { %v3187_v18 = vpop.eup %3186 }
0x267e   :  { %2161 = vrot.lane.b32.xlu0 %v3187_v18, %s3206_s28 }
0x26f0   :  { %v2162_v19 = vpop.permute.xlu0 %2161 }
0x26f1   :  { %v2164_v20 = vmul.f32 %v3185_v6, %v2162_v19 }
0x26f3   :  { %2166 = vrot.lane.b32.xlu1 %v2164_v20, %s3207_s3 }
0x2765   :  { %v2167_v21 = vpop.permute.xlu1 %2166 }
0x2766   :  { %3021 = vmatmul.mubr.msk.f32.vlgmr.msra.gmra.mxu1 %vm138_vm2, %v2167_v21  ;;  %3032 = vmatmul.mubr.msk.f32.vlgmr.msra.gmra.mxu0 %vm138_vm2, %v2167_v21 }
0x2767   :  { %3035 = vmatpush3.msra.mxu1 %v3532_v26  ;;  %3046 = vmatpush3.msra.mxu0 %v3537_v27 }
0x2768   :  { %3036 = vmatprep.subr.mxu1 %v3204_v0  ;;  %3047 = vmatprep.subr.mxu0 %v3204_v0 }
0x2769   :  { %3037 = vmatpush3.msra.mxu1 %v3542_v28  ;;  %3048 = vmatpush3.msra.mxu0 %v3549_v29 }
0x276a   :  { %3038 = vmatprep.subr.mxu1 %v3204_v0  ;;  %3049 = vmatprep.subr.mxu0 %v3204_v0 }
0x276b   :  { %3039 = vmatpush3.msra.mxu1 %v3556_v30  ;;  %3050 = vmatpush3.msra.mxu0 %v3561_v10 }
0x276c   :  { %3040 = vmatprep.subr.mxu1 %v3204_v0  ;;  %3051 = vmatprep.subr.mxu0 %v3204_v0 }
0x276d   :  { %3041 = vmatpush3.msra.mxu1 %v3570_v31  ;;  %3042 = vmatprep.mubr.msk.f32.mxu1 %vm3205_vm0, %v3204_v0 }
0x276e   :  { %3052 = vmatpush3.msra.mxu0 %v3575_v32  ;;  %3053 = vmatprep.mubr.msk.f32.mxu0 %vm3205_vm0, %v3204_v0 }
0x276f   :  { %3056 = vmatprep.subr.mxu1 %v3204_v0 }
0x2826   :  { %v3766_v27 = vpop.f32.mrf.mxu1  ;;  %v2312_v29 = vpop.f32.mrf.mxu0 }
0x2827   :  { %v2313_v10 = vadd.f32 %v3617_v38, %v2312_v29  ;;  %v2237_v57 = vadd.f32 %v3612_v37, %v3766_v27 }
0x2828   :  { %v3022_v22 = vpop.f32.mrf.mxu1  ;;  %v3033_v23 = vpop.f32.mrf.mxu0 }
0x2829   :  { %3188 = vtanh.f32 %v2313_v10  ;;  %v2644_v25 = vmul.f32 -1.442695, %v2313_v10 }
0x282b   :  { %3190 = vpow2.f32 %v2644_v25 }
0x2836   :  { %v3189_v24 = vpop.eup %3188 }
0x2837   :  { %2325 = vrot.lane.b32.xlu0 %v3189_v24, %s3206_s28 }
0x2838   :  { %v3191_v33 = vpop.eup %3190 }
0x2839   :  { %v2319_v32 = vadd.f32 1.0, %v3191_v33 }
0x283b   :  { %3192 = vrcp.f32 %v2319_v32 }
0x2848   :  { %v3193_v34 = vpop.eup %3192 }
0x2849   :  { %v2323_v39 = vmul.f32 %v3193_v34, %v2158_v17 }
0x28a9   :  { %v2326_v35 = vpop.permute.xlu0 %2325 }
0x28aa   :  { %v2328_v36 = vmul.f32 %v3193_v34, %v2326_v35 }
0x28ac   :  { %2330 = vrot.lane.b32.xlu1 %v2328_v36, %s3207_s3 }
0x291e   :  { %v2331_v40 = vpop.permute.xlu1 %2330 }
0x291f   :  { %v2333_v41 = vadd.f32 %v2331_v40, %v2323_v39 }
0x2921   :  { %3194 = vtanh.f32 %v2333_v41 }
0x292e   :  { %v3195_v42 = vpop.eup %3194 }
0x292f   :  { %2336 = vrot.lane.b32.xlu0 %v3195_v42, %s3206_s28 }
0x29a1   :  { %v2337_v43 = vpop.permute.xlu0 %2336 }
0x29a2   :  { %v2339_v45 = vmul.f32 %v3193_v34, %v2337_v43 }
0x29a4   :  { %2341 = vrot.lane.b32.xlu1 %v2339_v45, %s3207_s3 }
0x2a16   :  { %v2342_v46 = vpop.permute.xlu1 %2341 }
0x2a17   :  { %3043 = vmatmul.mubr.msk.f32.vlgmr.msra.gmra.mxu1 %vm138_vm2, %v2342_v46  ;;  %3054 = vmatmul.mubr.msk.f32.vlgmr.msra.gmra.mxu0 %vm138_vm2, %v2342_v46 }
0x2a18   :  { %3057 = vmatpush3.msra.mxu1 %v3532_v26  ;;  %3064 = vmatprep.mubr.msk.f32.mxu1 %vm3205_vm0, %v3204_v0 }
0x2a19   :  { %3058 = vmatprep.subr.mxu1 %v3204_v0 }
0x2a1a   :  { %3059 = vmatpush3.msra.mxu1 %v3542_v28 }
0x2a1b   :  { %3060 = vmatprep.subr.mxu1 %v3204_v0 }
0x2a1c   :  { %3061 = vmatpush3.msra.mxu1 %v3556_v30 }
0x2a1d   :  { %3062 = vmatprep.subr.mxu1 %v3204_v0 }
0x2a1e   :  { %3063 = vmatpush3.msra.mxu1 %v3570_v31 }
0x2ad7   :  { %v2411_v47 = vpop.f32.mrf.mxu1  ;;  %v2487_v48 = vpop.f32.mrf.mxu0 }
0x2ad8   :  { %v2488_v49 = vadd.f32 %v3617_v38, %v2487_v48  ;;  %v2412_v60 = vadd.f32 %v3612_v37, %v2411_v47 }
0x2ad9   :  { %v3044_v26 = vpop.f32.mrf.mxu1  ;;  %v3055_v50 = vpop.f32.mrf.mxu0 }
0x2ada   :  { %3196 = vtanh.f32 %v2488_v49  ;;  %v2647_v11 = vmul.f32 -1.442695, %v2488_v49 }
0x2adc   :  { %3198 = vpow2.f32 %v2647_v11 }
0x2ae7   :  { %v3197_v9 = vpop.eup %3196 }
0x2ae8   :  { %2500 = vrot.lane.b32.xlu0 %v3197_v9, %s3206_s28 }
0x2ae9   :  { %v3199_v28 = vpop.eup %3198 }
0x2aea   :  { %v2494_v51 = vadd.f32 1.0, %v3199_v28 }
0x2aec   :  { %3200 = vrcp.f32 %v2494_v51 }
0x2af9   :  { %v3201_v30 = vpop.eup %3200 }
0x2afa   :  { %v2498_v31 = vmul.f32 %v3201_v30, %v2333_v41 }
0x2b5a   :  { %v2501_v52 = vpop.permute.xlu0 %2500 }
0x2b5b   :  { %v2503_v0 = vmul.f32 %v3201_v30, %v2501_v52 }
0x2b5d   :  { %2505 = vrot.lane.b32.xlu1 %v2503_v0, %s3207_s3 }
0x2bcf   :  { %v2506_v53 = vpop.permute.xlu1 %2505 }
0x2bd0   :  { %v2508_v54 = vadd.f32 %v2506_v53, %v2498_v31 }
0x2bd2   :  { %3202 = vtanh.f32 %v2508_v54 }
0x2bdf   :  { %v3203_v38 = vpop.eup %3202 }
0x2be0   :  { %2511 = vrot.lane.b32.xlu0 %v3203_v38, %s3206_s28 }
0x2be4   :  { %1541 = vrot.lane.b32.xlu0 %v1537_v55, %s3208_s11 }
0x2be8   :  { %1891 = vrot.lane.b32.xlu0 %v1887_v56, %s3209_s13 }
0x2bec   :  { %2241 = vrot.lane.b32.xlu0 %v2237_v57, %s3210_s2 }
0x2c52   :  { %v2512_v58 = vpop.permute.xlu0 %2511 }
0x2c53   :  { %v2514_v59 = vmul.f32 %v3201_v30, %v2512_v58 }
0x2c55   :  { %2516 = vrot.lane.b32.xlu1 %v2514_v59, %s3207_s3 }
0x2c56   :  { %v1542_v4 = vpop.permute.xlu0 %1541 }
0x2c57   :  { %1545 = vst.msk [vmem:[%s3839_s14] sm:$0x3] %vm1544_vm5, %v1542_v4 }
0x2c59   :  { %1716 = vrot.lane.b32.xlu1 %v1712_v2, %s3207_s3 }
0x2c5a   :  { %v1892_v16 = vpop.permute.xlu0 %1891 }
0x2c5d   :  { %2066 = vrot.lane.b32.xlu1 %v2062_v44, %s3206_s28 }
0x2c5e   :  { %v2242_v62 = vpop.permute.xlu0 %2241 }
0x2c61   :  { %2416 = vrot.lane.b32.xlu1 %v2412_v60, %s3211_s15 }
0x2cc7   :  { %v2517_v61 = vpop.permute.xlu1 %2516 }
0x2cc8   :  { %3065 = vmatmul.mubr.msk.f32.vlgmr.msra.gmra.mxu1 %vm138_vm2, %v2517_v61 }
0x2ccb   :  { %v1717_v8 = vpop.permute.xlu1 %1716 }
0x2ccc   :  { %1720 = vst.msk [vmem:[%s3839_s14] sm:$0x3] %vm1719_vm6, %v1717_v8 }
0x2ccd   :  { %1895 = vst.msk [vmem:[%s3839_s14] sm:$0x3] %vm1894_vm7, %v1892_v16 }
0x2ccf   :  { %v2067_v7 = vpop.permute.xlu1 %2066 }
0x2cd0   :  { %2070 = vst.msk [vmem:[%s3839_s14] sm:$0x3] %vm2069_vm8, %v2067_v7 }
0x2cd1   :  { %2245 = vst.msk [vmem:[%s3839_s14] sm:$0x3] %vm2244_vm9, %v2242_v62 }
0x2cd3   :  { %v2417_v63 = vpop.permute.xlu1 %2416 }
0x2cd4   :  { %2420 = vst.msk [vmem:[%s3839_s14] sm:$0x3] %vm2419_vm10, %v2417_v63 }
0x2d88   :  { %v2586_v1 = vpop.f32.mrf.mxu1 }
0x2d89   :  { %v2587_v3 = vadd.f32 %v3612_v37, %v2586_v1 }
0x2d8a   :  { %v3066_v5 = vpop.f32.mrf.mxu1 }
0x2d8b   :  { %2591 = vrot.lane.b32.xlu0 %v2587_v3, %s3212_s21 }
0x2dfd   :  { %v2592_v6 = vpop.permute.xlu0 %2591 }
0x2dfe   :  { %2595 = vst.msk [vmem:[%s3839_s14] sm:$0x3] %vm2594_vm11, %v2592_v6 }

</bundles_post_ra>
